<compile_context>
chip_gen: v7x
topology: tpu7x:2x2x1
jax: 0.10.0
libtpu: 0.0.40
codegen_flags: <defaults>
</compile_context>

<pallas_src>
import functools

import jax
import jax.numpy as jnp
from jax.experimental import pallas as pl
from jax.experimental.pallas import tpu as pltpu


# ----------------------------- fused kernel ---------------------------------
def eq2_kernel(num_heads, x_ref, ln_g_ref, ln_b_ref, w_qkv_ref, b_qkv_ref,
               w_o_ref, b_o_ref, o_ref):
    x = x_ref[...].astype(jnp.float32)                    # (S, D)
    S, D = x.shape
    hd = D // num_heads
    scale = 1.0 / (hd ** 0.5)

    # LayerNorm (f32, single-pass variance E[x^2] - mu^2, eps=1e-5).
    mu = jnp.mean(x, axis=-1, keepdims=True)
    var = jnp.mean(x * x, axis=-1, keepdims=True) - mu * mu
    h = (x - mu) * jax.lax.rsqrt(var + 1e-5) * ln_g_ref[...] + ln_b_ref[...]

    # QKV projection: bf16 operands, f32 accumulation, pre-transposed weight.
    qkv = jnp.dot(h.astype(jnp.bfloat16), w_qkv_ref[...],
                  preferred_element_type=jnp.float32) + b_qkv_ref[...]
    q = qkv[:, 0:D] * scale                               # fold 1/sqrt(hd) once
    k = qkv[:, D:2 * D]
    v = qkv[:, 2 * D:3 * D]

    # Batched multi-head attention: head axis leading, one matmul per stage.
    qh = q.reshape(S, num_heads, hd).transpose(1, 0, 2).astype(jnp.bfloat16)
    kh = k.reshape(S, num_heads, hd).transpose(1, 0, 2).astype(jnp.bfloat16)
    vh = v.reshape(S, num_heads, hd).transpose(1, 0, 2).astype(jnp.bfloat16)

    s = jnp.einsum('hqd,hkd->hqk', qh, kh,
                   preferred_element_type=jnp.float32)    # (H, S, S)
    s = s - jnp.max(s, axis=-1, keepdims=True)
    p = jnp.exp(s)
    p = p * pl.reciprocal(jnp.sum(p, axis=-1, keepdims=True), approx=True)
    # attention dropout: identity (p = 0.0 / eval mode)

    ctx = jnp.einsum('hqk,hkd->hqd', p.astype(jnp.bfloat16), vh,
                     preferred_element_type=jnp.float32)  # (H, S, hd)
    attn = ctx.transpose(1, 0, 2).reshape(S, D)           # (S, D)

    # Output projection (pre-transposed weight, bf16 x bf16 -> f32).
    out = jnp.dot(attn.astype(jnp.bfloat16), w_o_ref[...],
                  preferred_element_type=jnp.float32) + b_o_ref[...]
    o_ref[...] = out.astype(o_ref.dtype)


# ------------------------------- wrapper -------------------------------------
def equation2_forward(x, params, *, num_heads):
    B, S, D = x.shape

    def resident(a):  # full-array block, constant across the batch grid axis
        nd = a.ndim
        return pl.BlockSpec(a.shape, lambda b, _nd=nd: (0,) * _nd)

    args = (params["ln_g"], params["ln_b"], params["w_qkv"], params["b_qkv"],
            params["w_o"], params["b_o"])

    return pl.pallas_call(
        functools.partial(eq2_kernel, num_heads),
        out_shape=jax.ShapeDtypeStruct((B, S, D), jnp.float32),
        grid=(B,),
        in_specs=[pl.BlockSpec((None, S, D), lambda b: (b, 0, 0))]
                 + [resident(a) for a in args],
        out_specs=pl.BlockSpec((None, S, D), lambda b: (b, 0, 0)),
        compiler_params=pltpu.CompilerParams(
            dimension_semantics=("parallel",)),   # 2 TCs on v7x; no-op on v5e/v6e
    )(x, *args)


# ------------------------------ parameters -----------------------------------
def init_params(key, D):
    k1, k2, k3, k4 = jax.random.split(key, 4)
    # PyTorch-layout raw weights (for the pure-JAX reference).
    w_in = jax.random.normal(k1, (3 * D, D), jnp.float32) * 0.02   # in_proj_weight
    b_in = jax.random.normal(k2, (3 * D,), jnp.float32) * 0.02     # in_proj_bias
    w_out = jax.random.normal(k3, (D, D), jnp.float32) * 0.02      # out_proj.weight
    b_out = jax.random.normal(k4, (D,), jnp.float32) * 0.02        # out_proj.bias
    raw = (w_in, b_in, w_out, b_out)

    # Kernel-side: pre-transposed, bf16 weights; f32 biases / LN params.
    params = dict(
        ln_g=jnp.ones((1, D), jnp.float32),
        ln_b=jnp.zeros((1, D), jnp.float32),
        w_qkv=w_in.T.astype(jnp.bfloat16),        # (D, 3D)
        b_qkv=b_in.reshape(1, 3 * D),
        w_o=w_out.T.astype(jnp.bfloat16),         # (D, D)
        b_o=b_out.reshape(1, D),
    )
    return raw, params


# --------------------------- pure-JAX reference -------------------------------
def reference(x, w_in, b_in, w_out, b_out, ln_g, ln_b, num_heads):
    B, S, D = x.shape
    hd = D // num_heads
    mu = x.mean(-1, keepdims=True)
    var = ((x - mu) ** 2).mean(-1, keepdims=True)
    h = (x - mu) / jnp.sqrt(var + 1e-5) * ln_g[0] + ln_b[0]
    qkv = h @ w_in.T + b_in
    q, k, v = qkv[..., :D], qkv[..., D:2 * D], qkv[..., 2 * D:]
    q = q.reshape(B, S, num_heads, hd).transpose(0, 2, 1, 3)
    k = k.reshape(B, S, num_heads, hd).transpose(0, 2, 1, 3)
    v = v.reshape(B, S, num_heads, hd).transpose(0, 2, 1, 3)
    s = (q @ jnp.swapaxes(k, -1, -2)) / jnp.sqrt(hd)
    p = jax.nn.softmax(s, axis=-1)
    ctx = (p @ v).transpose(0, 2, 1, 3).reshape(B, S, D)
    return ctx @ w_out.T + b_out


# --------------------------------- main ---------------------------------------
if __name__ == "__main__":
    B, S, D, HEADS = 2, 16, 128, 4    # lane-dense D, sublane-aligned S

    key = jax.random.PRNGKey(0)
    kx, kp = jax.random.split(key)
    x = jax.random.normal(kx, (B, S, D), jnp.float32)
    raw, params = init_params(kp, D)

    out = equation2_forward(x, params, num_heads=HEADS)
    jax.block_until_ready(out)

    ref = reference(x, *raw, params["ln_g"], params["ln_b"], HEADS)
    assert out.shape == (B, S, D) and out.dtype == jnp.float32
    max_err = float(jnp.max(jnp.abs(out - ref)))
    assert max_err < 5e-2, f"max abs error too large: {max_err}"
    print("KERNEL_OK")
</pallas_src>

<mosaic_0001>
module attributes {stable_mosaic.version = 11 : i64} {
  func.func @eq2_kernel(%arg0: i32, %arg1: memref<1x16x128xf32, #tpu.memory_space<vmem>>, %arg2: memref<1x128xf32, #tpu.memory_space<vmem>>, %arg3: memref<1x128xf32, #tpu.memory_space<vmem>>, %arg4: memref<128x384xbf16, #tpu.memory_space<vmem>>, %arg5: memref<1x384xf32, #tpu.memory_space<vmem>>, %arg6: memref<128x128xbf16, #tpu.memory_space<vmem>>, %arg7: memref<1x128xf32, #tpu.memory_space<vmem>>, %arg8: memref<1x16x128xf32, #tpu.memory_space<vmem>>) attributes {dimension_semantics = [#tpu.dimension_semantics<parallel>], iteration_bounds = array<i64: 2>, scalar_prefetch = 0 : i64, scratch_operands = 0 : i64, tpu.core_type = #tpu.core_type<tc>, window_params = [{transform_indices = @transform_0, window_bounds = array<i64: 1, 16, 128>}, {pipeline_mode = #tpu.pipeline_mode<synchronous>, transform_indices = @transform_1, window_bounds = array<i64: 1, 128>}, {pipeline_mode = #tpu.pipeline_mode<synchronous>, transform_indices = @transform_2, window_bounds = array<i64: 1, 128>}, {pipeline_mode = #tpu.pipeline_mode<synchronous>, transform_indices = @transform_3, window_bounds = array<i64: 128, 384>}, {pipeline_mode = #tpu.pipeline_mode<synchronous>, transform_indices = @transform_4, window_bounds = array<i64: 1, 384>}, {pipeline_mode = #tpu.pipeline_mode<synchronous>, transform_indices = @transform_5, window_bounds = array<i64: 128, 128>}, {pipeline_mode = #tpu.pipeline_mode<synchronous>, transform_indices = @transform_6, window_bounds = array<i64: 1, 128>}, {transform_indices = @transform_7, window_bounds = array<i64: 1, 16, 128>}]} {
    %c0 = arith.constant 0 : index
    %c0_0 = arith.constant 0 : index
    %c0_1 = arith.constant 0 : index
    %0 = vector.load %arg1[%c0, %c0_0, %c0_1] : memref<1x16x128xf32, #tpu.memory_space<vmem>>, vector<1x16x128xf32>
    %1 = vector.shape_cast %0 : vector<1x16x128xf32> to vector<16x128xf32>
    %cst = arith.constant dense<0.000000e+00> : vector<16xf32>
    %2 = vector.multi_reduction <add>, %1, %cst [1] : vector<16x128xf32> to vector<16xf32>
    %3 = vector.shape_cast %2 : vector<16xf32> to vector<16x1xf32>
    %cst_2 = arith.constant 1.280000e+02 : f32
    %4 = vector.broadcast %cst_2 : f32 to vector<16x1xf32>
    %5 = arith.divf %3, %4 : vector<16x1xf32>
    %6 = arith.mulf %1, %1 : vector<16x128xf32>
    %cst_3 = arith.constant dense<0.000000e+00> : vector<16xf32>
    %7 = vector.multi_reduction <add>, %6, %cst_3 [1] : vector<16x128xf32> to vector<16xf32>
    %8 = vector.shape_cast %7 : vector<16xf32> to vector<16x1xf32>
    %cst_4 = arith.constant 1.280000e+02 : f32
    %9 = vector.broadcast %cst_4 : f32 to vector<16x1xf32>
    %10 = arith.divf %8, %9 : vector<16x1xf32>
    %11 = arith.mulf %5, %5 : vector<16x1xf32>
    %12 = arith.subf %10, %11 : vector<16x1xf32>
    %13 = vector.broadcast %5 : vector<16x1xf32> to vector<16x128xf32>
    %14 = arith.subf %1, %13 : vector<16x128xf32>
    %cst_5 = arith.constant 9.99999974E-6 : f32
    %15 = vector.broadcast %cst_5 : f32 to vector<16x1xf32>
    %16 = arith.addf %12, %15 : vector<16x1xf32>
    %17 = math.rsqrt %16 : vector<16x1xf32>
    %18 = vector.broadcast %17 : vector<16x1xf32> to vector<16x128xf32>
    %19 = arith.mulf %14, %18 : vector<16x128xf32>
    %c0_6 = arith.constant 0 : index
    %c0_7 = arith.constant 0 : index
    %20 = vector.load %arg2[%c0_6, %c0_7] : memref<1x128xf32, #tpu.memory_space<vmem>>, vector<1x128xf32>
    %21 = vector.broadcast %20 : vector<1x128xf32> to vector<16x128xf32>
    %22 = arith.mulf %19, %21 : vector<16x128xf32>
    %c0_8 = arith.constant 0 : index
    %c0_9 = arith.constant 0 : index
    %23 = vector.load %arg3[%c0_8, %c0_9] : memref<1x128xf32, #tpu.memory_space<vmem>>, vector<1x128xf32>
    %24 = vector.broadcast %23 : vector<1x128xf32> to vector<16x128xf32>
    %25 = arith.addf %22, %24 : vector<16x128xf32>
    %26 = arith.truncf %25 : vector<16x128xf32> to vector<16x128xbf16>
    %c0_10 = arith.constant 0 : index
    %c0_11 = arith.constant 0 : index
    %27 = vector.load %arg4[%c0_10, %c0_11] : memref<128x384xbf16, #tpu.memory_space<vmem>>, vector<128x384xbf16>
    %cst_12 = arith.constant dense<0.000000e+00> : vector<16x384xf32>
    %28 = tpu.matmul %26, %27, %cst_12 {dimension_numbers = #tpu.dot_dimension_numbers<[1], [0], [0], [1], [0, 0, 1, 1], [], []>} : vector<16x128xbf16>, vector<128x384xbf16>, vector<16x384xf32> -> vector<16x384xf32>
    %c0_13 = arith.constant 0 : index
    %c0_14 = arith.constant 0 : index
    %29 = vector.load %arg5[%c0_13, %c0_14] : memref<1x384xf32, #tpu.memory_space<vmem>>, vector<1x384xf32>
    %30 = vector.broadcast %29 : vector<1x384xf32> to vector<16x384xf32>
    %31 = arith.addf %28, %30 : vector<16x384xf32>
    %32 = vector.extract_strided_slice %31 {offsets = [0, 0], sizes = [16, 128], strides = [1, 1]} : vector<16x384xf32> to vector<16x128xf32>
    %cst_15 = arith.constant 0.176776692 : f32
    %33 = vector.broadcast %cst_15 : f32 to vector<16x128xf32>
    %34 = arith.mulf %32, %33 : vector<16x128xf32>
    %35 = vector.extract_strided_slice %31 {offsets = [0, 128], sizes = [16, 128], strides = [1, 1]} : vector<16x384xf32> to vector<16x128xf32>
    %36 = vector.extract_strided_slice %31 {offsets = [0, 256], sizes = [16, 128], strides = [1, 1]} : vector<16x384xf32> to vector<16x128xf32>
    %37 = vector.shape_cast %34 : vector<16x128xf32> to vector<16x4x32xf32>
    %38 = tpu.transpose %37, [1, 0, 2] : vector<16x4x32xf32> -> vector<4x16x32xf32>
    %39 = arith.truncf %38 : vector<4x16x32xf32> to vector<4x16x32xbf16>
    %40 = vector.shape_cast %35 : vector<16x128xf32> to vector<16x4x32xf32>
    %41 = tpu.transpose %40, [1, 0, 2] : vector<16x4x32xf32> -> vector<4x16x32xf32>
    %42 = arith.truncf %41 : vector<4x16x32xf32> to vector<4x16x32xbf16>
    %43 = vector.shape_cast %36 : vector<16x128xf32> to vector<16x4x32xf32>
    %44 = tpu.transpose %43, [1, 0, 2] : vector<16x4x32xf32> -> vector<4x16x32xf32>
    %45 = arith.truncf %44 : vector<4x16x32xf32> to vector<4x16x32xbf16>
    "tpu.trace_start"() <{level = 10 : i32, message = "hqd,hkd->hqk"}> : () -> ()
    %cst_16 = arith.constant dense<0.000000e+00> : vector<4x16x16xf32>
    %46 = tpu.matmul %39, %42, %cst_16 {dimension_numbers = #tpu.dot_dimension_numbers<[2], [2], [1], [1], [0, 0, 0, 1, 1, 1], [0], [0]>} : vector<4x16x32xbf16>, vector<4x16x32xbf16>, vector<4x16x16xf32> -> vector<4x16x16xf32>
    "tpu.trace_stop"() : () -> ()
    %cst_17 = arith.constant dense<0xFF800000> : vector<4x16xf32>
    %47 = vector.multi_reduction <maximumf>, %46, %cst_17 [2] : vector<4x16x16xf32> to vector<4x16xf32>
    %48 = vector.shape_cast %47 : vector<4x16xf32> to vector<4x16x1xf32>
    %49 = vector.broadcast %48 : vector<4x16x1xf32> to vector<4x16x16xf32>
    %50 = arith.subf %46, %49 : vector<4x16x16xf32>
    %51 = math.exp %50 : vector<4x16x16xf32>
    %cst_18 = arith.constant dense<0.000000e+00> : vector<4x16xf32>
    %52 = vector.multi_reduction <add>, %51, %cst_18 [2] : vector<4x16x16xf32> to vector<4x16xf32>
    %53 = vector.shape_cast %52 : vector<4x16xf32> to vector<4x16x1xf32>
    %54 = tpu.reciprocal %53 {approx = true} : vector<4x16x1xf32> -> vector<4x16x1xf32>
    %55 = vector.broadcast %54 : vector<4x16x1xf32> to vector<4x16x16xf32>
    %56 = arith.mulf %51, %55 : vector<4x16x16xf32>
    %57 = arith.truncf %56 : vector<4x16x16xf32> to vector<4x16x16xbf16>
    "tpu.trace_start"() <{level = 10 : i32, message = "hqk,hkd->hqd"}> : () -> ()
    %cst_19 = arith.constant dense<0.000000e+00> : vector<4x16x32xf32>
    %58 = tpu.matmul %57, %45, %cst_19 {dimension_numbers = #tpu.dot_dimension_numbers<[2], [1], [1], [2], [0, 0, 0, 1, 1, 2], [0], [0]>} : vector<4x16x16xbf16>, vector<4x16x32xbf16>, vector<4x16x32xf32> -> vector<4x16x32xf32>
    "tpu.trace_stop"() : () -> ()
    %59 = tpu.transpose %58, [1, 0, 2] : vector<4x16x32xf32> -> vector<16x4x32xf32>
    %60 = vector.shape_cast %59 : vector<16x4x32xf32> to vector<16x128xf32>
    %61 = arith.truncf %60 : vector<16x128xf32> to vector<16x128xbf16>
    %c0_20 = arith.constant 0 : index
    %c0_21 = arith.constant 0 : index
    %62 = vector.load %arg6[%c0_20, %c0_21] : memref<128x128xbf16, #tpu.memory_space<vmem>>, vector<128x128xbf16>
    %cst_22 = arith.constant dense<0.000000e+00> : vector<16x128xf32>
    %63 = tpu.matmul %61, %62, %cst_22 {dimension_numbers = #tpu.dot_dimension_numbers<[1], [0], [0], [1], [0, 0, 1, 1], [], []>} : vector<16x128xbf16>, vector<128x128xbf16>, vector<16x128xf32> -> vector<16x128xf32>
    %c0_23 = arith.constant 0 : index
    %c0_24 = arith.constant 0 : index
    %64 = vector.load %arg7[%c0_23, %c0_24] : memref<1x128xf32, #tpu.memory_space<vmem>>, vector<1x128xf32>
    %65 = vector.broadcast %64 : vector<1x128xf32> to vector<16x128xf32>
    %66 = arith.addf %63, %65 : vector<16x128xf32>
    %c0_25 = arith.constant 0 : index
    %c0_26 = arith.constant 0 : index
    %c0_27 = arith.constant 0 : index
    %67 = vector.load %arg8[%c0_25, %c0_26, %c0_27] : memref<1x16x128xf32, #tpu.memory_space<vmem>>, vector<1x16x128xf32>
    %68 = vector.shape_cast %67 : vector<1x16x128xf32> to vector<16x128xf32>
    %69 = vector.shape_cast %66 : vector<16x128xf32> to vector<1x16x128xf32>
    tpu.vector_store %arg8[%c0_25, %c0_26, %c0_27], %69 {strides = array<i32>} : memref<1x16x128xf32, #tpu.memory_space<vmem>>, vector<1x16x128xf32>,
    return
  }
  func.func @transform_0(%arg0: i32) -> (i32, i32, i32) {
    %c0_i32 = arith.constant 0 : i32
    %c0_i32_0 = arith.constant 0 : i32
    %c0_i32_1 = arith.constant 0 : i32
    return %arg0, %c0_i32, %c0_i32_0 : i32, i32, i32
  }
  func.func @transform_1(%arg0: i32) -> (i32, i32) {
    %c0_i32 = arith.constant 0 : i32
    %c0_i32_0 = arith.constant 0 : i32
    %c0_i32_1 = arith.constant 0 : i32
    return %c0_i32, %c0_i32_0 : i32, i32
  }
  func.func @transform_2(%arg0: i32) -> (i32, i32) {
    %c0_i32 = arith.constant 0 : i32
    %c0_i32_0 = arith.constant 0 : i32
    %c0_i32_1 = arith.constant 0 : i32
    return %c0_i32, %c0_i32_0 : i32, i32
  }
  func.func @transform_3(%arg0: i32) -> (i32, i32) {
    %c0_i32 = arith.constant 0 : i32
    %c0_i32_0 = arith.constant 0 : i32
    %c0_i32_1 = arith.constant 0 : i32
    return %c0_i32, %c0_i32_0 : i32, i32
  }
  func.func @transform_4(%arg0: i32) -> (i32, i32) {
    %c0_i32 = arith.constant 0 : i32
    %c0_i32_0 = arith.constant 0 : i32
    %c0_i32_1 = arith.constant 0 : i32
    return %c0_i32, %c0_i32_0 : i32, i32
  }
  func.func @transform_5(%arg0: i32) -> (i32, i32) {
    %c0_i32 = arith.constant 0 : i32
    %c0_i32_0 = arith.constant 0 : i32
    %c0_i32_1 = arith.constant 0 : i32
    return %c0_i32, %c0_i32_0 : i32, i32
  }
  func.func @transform_6(%arg0: i32) -> (i32, i32) {
    %c0_i32 = arith.constant 0 : i32
    %c0_i32_0 = arith.constant 0 : i32
    %c0_i32_1 = arith.constant 0 : i32
    return %c0_i32, %c0_i32_0 : i32, i32
  }
  func.func @transform_7(%arg0: i32) -> (i32, i32, i32) {
    %c0_i32 = arith.constant 0 : i32
    %c0_i32_0 = arith.constant 0 : i32
    %c0_i32_1 = arith.constant 0 : i32
    return %arg0, %c0_i32, %c0_i32_0 : i32, i32, i32
  }
}

</mosaic_0001>

<bundles_post_ra>
// kernel: tpu_custom_call.1
= control target key start
LH: loop header
LB: loop body
LE: loop exit
PB: predicated region body
PF: predicated region fallthrough
CT: control target
= control target key end

     0   :  { %12 = vsyncpa [#allocation3], 0  ;;  %s3709_s0 = inlined_call_operand.hbm [shape: f32[2,16,128], index: 0, kind: input, shape index: {}]   ;;  %s3710_s1 = inlined_call_operand.vmem [shape: f32[1,128], index: 1, kind: input, shape index: {}]   ;;  %s3711_s2 = inlined_call_operand.vmem [shape: f32[1,128], index: 2, kind: input, shape index: {}]   ;;  %s3712_s3 = inlined_call_operand.hbm [shape: bf16[128,384], index: 3, kind: input, shape index: {}]   ;;  %s3713_s4 = inlined_call_operand.vmem [shape: f32[1,384], index: 4, kind: input, shape index: {}]   ;;  %s3714_s5 = inlined_call_operand.hbm [shape: bf16[128,128], index: 5, kind: input, shape index: {}]   ;;  %s3715_s6 = inlined_call_operand.vmem [shape: f32[1,128], index: 6, kind: input, shape index: {}]   ;;  %s3716_s7 = inlined_call_operand.hbm [shape: f32[2,16,128], index: 7, kind: output, shape index: {}]  }
   0x1   :  { %14 = vsyncpa [#allocation3 + $0x1], 0 }
   0x2   :  { %15 = vsyncpa [#allocation6], 0 }
   0x3   :  { %16 = vsyncpa [#allocation4], 0 }
   0x4   :  { %18 = vsyncpa [#allocation4 + $0x1], 0  ;;  %s3102_s24 = smov 0   ;;  %s3104_s25 = smov 0  }
   0x5   :  { %s3106_s26 = smov 0   ;;  %s3108_s27 = smov 0  }
   0x6 LB: > { %s3123_s28 = sadd.s32 4294967295, %s3040_s27   ;;  %s2509_s29 = sadd.s32 4294967294, %s3040_s27   ;;  %s3040_s27 = sphi %s3108_s27, %s3736_s27   ;;  %s3036_s26 = sphi %s3106_s26, %s3735_s26   ;;  %s3032_s25 = sphi %s3104_s25, %s3734_s25   ;;  %s3028_s24 = sphi %s3102_s24, %s3733_s24  }
   0x7   : > { %p44_p0 = scmp.ne.s32.totalorder %s3032_s25, %s3028_s24  ;;  %p3717_p1 = scmp.eq.s32.totalorder %s3123_s28, 0 }
   0x8   : > { %p200_p3 = scmp.eq.s32.totalorder %s2509_s29, 1  ;;  %p2510_p5 = scmp.ge.s32.totalorder %s3040_s27, 1 }
   0x9   : > { %p3132_p4 = por %p3717_p1, %p44_p0  ;;  %p207_p7 = scmp.lt.s32.totalorder %s3040_s27, 3 }
   0xa   : > { %p3137_p6 = por %p200_p3, %p44_p0  ;;  %s3042_s10 = smov [#allocation5]  }
   0xb   : > { %s3720_s30 = scalar_select %p3132_p4, 1, 0 }
   0xc   : > { %s3721_s8 = scalar_select %p3137_p6, 1, 0 }
   0xd   : > { %p3142_p8 = pnand %p2510_p5, %p207_p7  ;;  %s225_s11 = sshll.u32 %s3042_s10, 4  ;;  %s3146_s11 = int_to_ptr.vmem [resolvable:$true] %s225_s11 }
   0xe   : > { %s3043_s13 = smov [#allocation7]   ;;  %s2884_s17 = scalar_lea.hbm %s3712_s3, 3072 }
   0xf   : > { %p2722_p9 = pneg %p3142_p8  ;;  %s241_s14 = sshll.u32 %s3043_s13, 4  ;;  %s3157_s14 = int_to_ptr.vmem [resolvable:$true] %s241_s14 }
  0x10   : > { %p2885_p12 = scmp.ne.s32.totalorder %s3712_s3, %s2884_s17  ;;  %p2891_p5 = scmp.lt.u32.totalorder %s2884_s17, %s3712_s3 }
  0x11   : > { %p3153_p11 = pnand %p2722_p9, %p3717_p1 }
  0x13   : > { %p2886_p13 = pneg %p3153_p11 }
  0x15   : > { %p2887_p0 = pnand %p2886_p13, %p2885_p12 }
  0x17   : > { %p2888_p3 = pneg %p2887_p0 }
  0x19   : > { %p2893_p7 = pnand %p2891_p5, %p2888_p3 }
  0x1b   : > { %2896 = shalt.err (!%p2893_p7)
}
  0x1c   : > { %s2897_s22 = scalar_lea.vmem %s3146_s11, 3072  ;;  %p2905_p2 = scmp.lt.s32.totalorder %s3146_s11, %s3146_s11 }
  0x1d   : > { %p2898_p9 = scmp.ne.s32.totalorder %s3146_s11, %s2897_s22  ;;  %p2906_p12 = scmp.lt.s32.totalorder %s2897_s22, %s2897_s22 }
  0x1f   : > { %p2900_p10 = pnand %p2898_p9, %p2886_p13  ;;  %p2907_p0 = por %p2906_p12, %p2905_p2 }
  0x21   : > { %p2901_p1 = pneg %p2900_p10 }
  0x23   : > { %p2908_p6 = pnand %p2907_p0, %p2901_p1 }
  0x25   : > { %2911 = shalt.err (!%p2908_p6)
}
  0x26   : > { %s3044_s23 = smov 192   ;;  %s3045_s29 = smov 12  }
  0x27   : > { %2725 = dma.hbm_to_vmem [thread:$0]  (!%p3153_p11), %s3712_s3, 3072, %s3146_s11, [#allocation6], %s3044_s23, %s3044_s23, %s3045_s29  }
  0x28   : > { %s2912_s17 = scalar_lea.hbm %s3714_s5, 1024 }
  0x29   : > { %p2913_p2 = scmp.ne.s32.totalorder %s3714_s5, %s2912_s17  ;;  %p2919_p10 = scmp.lt.u32.totalorder %s2912_s17, %s3714_s5 }
  0x2b   : > { %p2915_p1 = pnand %p2913_p2, %p2886_p13 }
  0x2d   : > { %p2916_p6 = pneg %p2915_p1 }
  0x2f   : > { %p2921_p3 = pnand %p2919_p10, %p2916_p6 }
  0x31   : > { %2924 = shalt.err (!%p2921_p3)
}
  0x32   : > { %s2925_s11 = scalar_lea.vmem %s3157_s14, 1024  ;;  %p2933_p12 = scmp.lt.s32.totalorder %s3157_s14, %s3157_s14 }
  0x33   : > { %p2926_p5 = scmp.ne.s32.totalorder %s3157_s14, %s2925_s11  ;;  %p2934_p0 = scmp.lt.s32.totalorder %s2925_s11, %s2925_s11 }
  0x35   : > { %p2928_p7 = pnand %p2926_p5, %p2886_p13  ;;  %p2935_p2 = por %p2934_p0, %p2933_p12 }
  0x37   : > { %p2929_p9 = pneg %p2928_p7 }
  0x39   : > { %p2936_p1 = pnand %p2935_p2, %p2929_p9 }
  0x3b   : > { %2939 = shalt.err (!%p2936_p1)
}
  0x3c   : > { %s3046_s22 = smov 64   ;;  %s3047_s23 = smov 4  }
  0x3d   : > { %2728 = dma.hbm_to_vmem [thread:$0]  (!%p3153_p11), %s3714_s5, 1024, %s3157_s14, [#allocation6], %s3046_s22, %s3046_s22, %s3047_s23  }
  0x3e   : > { %s3212_s13 = sadd.s32 1, %s3040_s27   ;;  %s31_s16 = sadd.s32 1, %s3036_s26 }
  0x3f   : > { %s28_s15 = ssub.s32 %s3040_s27, %s3212_s13  ;;  %p38_p6 = scmp.ne.s32.totalorder %s3036_s26, %s3032_s25 }
  0x40   : > { %p29_p13 = scmp.eq.s32.totalorder %s28_s15, 0  ;;  %p39_p10 = scmp.eq.s32.totalorder %s3040_s27, 0 }
  0x41   : > { %p3724_p5 = scmp.eq.s32.totalorder %s3123_s28, 1  ;;  %p2739_p9 = scmp.lt.s32.totalorder %s3040_s27, 2 }
  0x42   : > { %s3221_s17 = scalar_select %p29_p13, %s3036_s26, %s31_s16  }
  0x43   : > { %p40_p3 = por %p39_p10, %p38_p6  ;;  %p3225_p7 = por %p3724_p5, %p38_p6 }
  0x44   : > { %s258_s12 = sand.u32 1, %s3036_s26   ;;  %s2586_s14 = sshll.u32 %s3040_s27, 8 }
  0x45   : > { %s3725_s18 = scalar_select %p3225_p7, 1, 0 }
  0x46   : > { %s2514_s19 = sshll.u32 %s258_s12, 4  ;;  %s3235_s11 = scalar_lea.hbm %s3709_s0, %s2586_s14 }
  0x47   : > { %s262_s22 = scalar_lea.vmem [#allocation2], %s2514_s19  ;;  %p3239_p11 = pnand %p2739_p9, %p40_p3 }
  0x48   : > { %s269_s23 = sshll.u32 %s262_s22, 4  ;;  %s3243_s10 = scalar_lea.sflag [#allocation3], %s258_s12  ;;  %s3237_s23 = int_to_ptr.vmem [resolvable:$true] %s269_s23 }
  0x49   : > { %s2940_s15 = scalar_lea.hbm %s3235_s11, 256  ;;  %p2942_p0 = pneg %p3239_p11 }
  0x4a   : > { %p2941_p12 = scmp.ne.s32.totalorder %s3235_s11, %s2940_s15  ;;  %s2945_s14 = scalar_lea.hbm %s3709_s0, 512 }
  0x4b   : > { %p2946_p13 = scmp.lt.u32.totalorder %s3235_s11, %s3709_s0  ;;  %p2947_p6 = scmp.lt.u32.totalorder %s2945_s14, %s2940_s15 }
  0x4c   : > { %p2943_p2 = pnand %p2942_p0, %p2941_p12  ;;  %p2949_p3 = scmp.lt.u32.totalorder %s2940_s15, %s3235_s11 }
  0x4d   : > { %p2948_p10 = por %p2947_p6, %p2946_p13 }
  0x4e   : > { %p2944_p1 = pneg %p2943_p2 }
  0x4f   : > { %p2950_p5 = por %p2949_p3, %p2948_p10 }
  0x51   : > { %p2951_p9 = pnand %p2950_p5, %p2944_p1 }
  0x53   : > { %2954 = shalt.err (!%p2951_p9)
}
  0x54   : > { %s2955_s12 = scalar_lea.vmem %s3237_s23, 256  ;;  %s3048_s22 = smov [#allocation2]  }
  0x55   : > { %p2956_p12 = scmp.ne.s32.totalorder %s3237_s23, %s2955_s12  ;;  %s2960_s16 = sshll.u32 %s3048_s22, 4  ;;  %s2961_s16 = int_to_ptr.vmem [resolvable:$false] %s2960_s16 }
  0x56   : > { %s2962_s19 = scalar_lea.vmem %s2961_s16, 512  ;;  %p2963_p4 = scmp.lt.s32.totalorder %s3237_s23, %s2961_s16 }
  0x57   : > { %p2958_p2 = pnand %p2956_p12, %p2942_p0  ;;  %p2964_p13 = scmp.lt.s32.totalorder %s2962_s19, %s2955_s12 }
  0x59   : > { %p2959_p7 = pneg %p2958_p2  ;;  %p2965_p6 = por %p2964_p13, %p2963_p4 }
  0x5b   : > { %p2966_p10 = pnand %p2965_p6, %p2959_p7 }
  0x5d   : > { %2969 = shalt.err (!%p2966_p10)
}
  0x5e   : > { %s3049_s15 = smov 128   ;;  %s3050_s14 = smov 8  }
  0x5f   : > { %2732 = dma.hbm_to_vmem [thread:$0]  (!%p3239_p11), %s3235_s11, 256, %s3237_s23, %s3243_s10, %s3049_s15, %s3049_s15, %s3050_s14  }
  0x60   : > { %281 = sbr.rel (%p3142_p8) target bundleno = 1849 (0x739), region = 48  ;;  %s3274_s20 = sand.u32 (!%p3142_p8), 1, %s3032_s25  }
  0x61   : > { %s2518_s21 = sshll.u32 (!%p3142_p8), %s3274_s20, 4  ;;  %s284_s12 = scalar_lea.sflag (!%p3142_p8), [#allocation3], %s3274_s20 }
  0x62   : > { %s287_s22 = scalar_lea.vmem (!%p3142_p8), [#allocation2], %s2518_s21  ;;  %p3727_p4 = scmp.ne.s32.totalorder (!%p3142_p8), %s3720_s30, 0 }
  0x67   : > { %3015 = dma.done.wait (%p3727_p4), %s284_s12, 256  }
  0x68   : > { %3017 = vsyncadd (%p3727_p4), %s284_s12, 4294967040  ;;  %p3728_p7 = scmp.eq.s32.totalorder %s3123_s28, 0 }
  0x6a   : > { %3019 = dma.done.wait (%p3728_p7), [#allocation6], 4096   ;;  %p3729_p8 = pmov %p3728_p7 }
  0x6b   : > { %v3051_v0 = vmov 0.0   ;;  %v3289_v1 = vld [vmem:[%s287_s22] sm:$0xff]  ;;  %v3291_v2 = vld [vmem:[%s287_s22 + $0x8] sm:$0xff]  ;;  %v3052_v24 = vmov 0   ;;  %vm3053_vm0 = vmmov 0   ;;  %v409_v57 = vlaneseq  ;;  %s3054_s16 = smov 64  }
  0x6c   : > { %3021 = vsyncadd (%p3729_p8), [#allocation6], 4294963200  ;;  %2622 = vmatprep.subr.bf16.mxu1 %v3051_v0  ;;  %329 = vadd.xlane.f32.xlu0 %v3289_v1  ;;  %v336_v3 = vmul.f32 %v3289_v1, %v3289_v1  ;;  %v2808_v4 = vld [vmem:[#allocation5 + $0x4] ss:$12 sps:$4 sm:$0xff]   ;;  %v337_v5 = vmul.f32 %v3291_v2, %v3291_v2  ;;  %v2810_v6 = vld [vmem:[#allocation5] ss:$12 sps:$4 sm:$0xff]  }
  0x6d   : > { %552 = vmatprep.subr.bf16.mxu0 %v2808_v4  ;;  %v2811_v7 = vld [vmem:[#allocation5 + $0x8] ss:$12 sps:$4 sm:$0xff]   ;;  %v2814_v9 = vld [vmem:[#allocation5 + $0x18] ss:$12 sps:$4 sm:$0xff]   ;;  %v2815_v10 = vld [vmem:[#allocation5 + $0x20] ss:$12 sps:$4 sm:$0xff]   ;;  %584 = vmatprep.mubr.bf16.mxu0 %v3052_v24 }
  0x6e   : > { %338 = vadd.xlane.f32.xlu1 %v336_v3  ;;  %553 = vmatpush1.bf16.msra.mxu0 %v2810_v6  ;;  %v2812_v8 = vld [vmem:[#allocation5 + $0x1c] ss:$12 sps:$4 sm:$0xff]   ;;  %v2816_v11 = vld [vmem:[#allocation5 + $0x34] ss:$12 sps:$4 sm:$0xff]   ;;  %v2819_v13 = vld [vmem:[#allocation5 + $0x38] ss:$12 sps:$4 sm:$0xff]  }
  0x6f   : > { %2623 = vmatpush3.bf16.msra.mxu1 %v2811_v7  ;;  %554 = vmatprep.subr.bf16.mxu0 %v2812_v8  ;;  %v2818_v12 = vld [vmem:[#allocation5 + $0x30] ss:$12 sps:$4 sm:$0xff]   ;;  %v2820_v14 = vld [vmem:[#allocation5 + $0x4c] ss:$12 sps:$4 sm:$0xff]   ;;  %v2822_v15 = vld [vmem:[#allocation5 + $0x48] ss:$12 sps:$4 sm:$0xff]  }
  0x70   : > { %331 = vadd.xlane.f32.xlu0 %v3291_v2  ;;  %2624 = vmatprep.subr.bf16.mxu1 %v3051_v0  ;;  %v2823_v16 = vld [vmem:[#allocation5 + $0x50] ss:$12 sps:$4 sm:$0xff]   ;;  %v2826_v18 = vld [vmem:[#allocation5 + $0x60] ss:$12 sps:$4 sm:$0xff]   ;;  %v2827_v19 = vld [vmem:[#allocation5 + $0x68] ss:$12 sps:$4 sm:$0xff]  }
  0x71   : > { %v2824_v17 = vld [vmem:[#allocation5 + $0x64] ss:$12 sps:$4 sm:$0xff]   ;;  %v2828_v20 = vld [vmem:[#allocation5 + $0x7c] ss:$12 sps:$4 sm:$0xff]   ;;  %v2831_v22 = vld [vmem:[#allocation5 + $0x80] ss:$12 sps:$4 sm:$0xff]   ;;  %2638 = vmatprep.mubr.msk.bf16.mxu1 %vm3053_vm0, %v3051_v0 }
  0x72   : > { %340 = vadd.xlane.f32.xlu1 %v337_v5  ;;  %555 = vmatpush1.bf16.msra.mxu0 %v2814_v9  ;;  %v2830_v21 = vld [vmem:[#allocation5 + $0x78] ss:$12 sps:$4 sm:$0xff]   ;;  %v2832_v23 = vld [vmem:[#allocation5 + $0x94] ss:$12 sps:$4 sm:$0xff]   ;;  %v2834_v25 = vld [vmem:[#allocation5 + $0x90] ss:$12 sps:$4 sm:$0xff]  }
  0x73   : > { %2625 = vmatpush3.bf16.msra.mxu1 %v2815_v10  ;;  %556 = vmatprep.subr.bf16.mxu0 %v2816_v11  ;;  %v2835_v26 = vld [vmem:[#allocation5 + $0x98] ss:$12 sps:$4 sm:$0xff]   ;;  %v2838_v28 = vld [vmem:[#allocation5 + $0xa8] ss:$12 sps:$4 sm:$0xff]   ;;  %v2839_v29 = vld [vmem:[#allocation5 + $0xb0] ss:$12 sps:$4 sm:$0xff]  }
  0x74   : > { %2626 = vmatprep.subr.bf16.mxu1 %v3051_v0  ;;  %v2836_v27 = vld [vmem:[#allocation5 + $0xac] ss:$12 sps:$4 sm:$0xff]   ;;  %v2522_v47 = vld [vmem:[%s3710_s1] ss:$0 sm:$0xff]  ;;  %v3322_v58 = vshrl.u32 %v409_v57, 7  ;;  %s3055_s19 = smov 96  }
  0x75   : > { %v2523_v52 = vld [vmem:[%s3711_s2] ss:$0 sm:$0xff]  ;;  %s3056_s15 = smov 32   ;;  %vm1526_vm1 = vcmask 261120   ;;  %vm1715_vm2 = vcmask 130048   ;;  %vm2282_vm3 = vcmask 523264  }
  0x76   : > { %557 = vmatpush1.bf16.msra.mxu0 %v2818_v12  ;;  %v415_v59 = vsub.s32 1, %v3322_v58  ;;  %v3328_v60 = vld [vmem:[%s3713_s4] sm:$0x7]  ;;  %v411_v61 = vsub.s32 0, %v3322_v58  ;;  %vm2285_vm4 = vcmask 785408   ;;  %s325_s22 = scalar_lea.vmem [#allocation8], %s2518_s21 }
  0x77   : > { %2627 = vmatpush3.bf16.msra.mxu1 %v2819_v13  ;;  %558 = vmatprep.subr.bf16.mxu0 %v2820_v14  ;;  %s2417_s30 = sshll.u32 %s325_s22, 4  ;;  %s2587_s9 = sshll.u32 %s3123_s28, 8  ;;  %s3660_s30 = int_to_ptr.vmem [resolvable:$true] %s2417_s30 }
  0x78   : > { %2628 = vmatprep.subr.bf16.mxu1 %v3051_v0  ;;  %v416_v62 = vrot.slane %v3328_v60, %v415_v59  ;;  %v412_v4 = vrot.slane %v3328_v60, %v411_v61  ;;  %s3665_s29 = scalar_lea.hbm %s3716_s7, %s2587_s9  ;;  %s2404_s21 = scalar_lea.sflag [#allocation4], %s3274_s20 }
  0x79   : > { %s2970_s28 = scalar_lea.vmem %s3660_s30, 256  ;;  %p3730_p0 = scmp.ne.s32.totalorder %s3725_s18, 0 }
  0x7a   : > { %559 = vmatpush1.bf16.msra.mxu0 %v2822_v15  ;;  %v3057_v15 = vmov 1983009808   ;;  %p2971_p11 = scmp.ne.s32.totalorder %s3660_s30, %s2970_s28  ;;  %s3059_s10 = smov [#allocation8]  }
  0x7b   : > { %2629 = vmatpush3.bf16.msra.mxu1 %v2823_v16  ;;  %560 = vmatprep.subr.bf16.mxu0 %v2824_v17  ;;  %v661_v16 = vunpack.c.l.s4 %v3057_v15  ;;  %v3058_v17 = vmov 1934713408  }
  0x7c   : > { %2630 = vmatprep.subr.bf16.mxu1 %v3051_v0  ;;  %p2972_p1 = pnand %p2971_p11, %p3730_p0 }
  0x7e   : > { %561 = vmatpush1.bf16.msra.mxu0 %v2826_v18  ;;  %v693_v18 = vunpack.c.l.s4 %v3058_v17  ;;  %p2973_p3 = pneg %p2972_p1 }
  0x7f   : > { %2631 = vmatpush3.bf16.msra.mxu1 %v2827_v19  ;;  %562 = vmatprep.subr.bf16.mxu0 %v2828_v20  ;;  %v662_v19 = vunpack.c.0.s8 %v661_v16 }
  0x80   : > { %2632 = vmatprep.subr.bf16.mxu1 %v3051_v0 }
  0x82   : > { %563 = vmatpush1.bf16.msra.mxu0 %v2830_v21 }
  0x83   : > { %2633 = vmatpush3.bf16.msra.mxu1 %v2831_v22  ;;  %564 = vmatprep.subr.bf16.mxu0 %v2832_v23  ;;  %v694_v22 = vunpack.c.0.s8 %v693_v18  ;;  %v3360_v23 = vsub.s32 %v662_v19, %v3322_v58 }
  0x84   : > { %2634 = vmatprep.subr.bf16.mxu1 %v3051_v0 }
  0x86   : > { %565 = vmatpush1.bf16.msra.mxu0 %v2834_v25 }
  0x87   : > { %2635 = vmatpush3.bf16.msra.mxu1 %v2835_v26  ;;  %566 = vmatprep.subr.bf16.mxu0 %v2836_v27 }
  0x88   : > { %2636 = vmatprep.subr.bf16.mxu1 %v3051_v0 }
  0x8a   : > { %567 = vmatpush1.bf16.msra.mxu0 %v2838_v28 }
  0x8b   : > { %2637 = vmatpush3.bf16.msra.mxu1 %v2839_v29  ;;  %2666 = vmatprep.subr.bf16.mxu0 %v3051_v0 }
  0x8c   : > { %2642 = vmatprep.subr.bf16.mxu1 %v3051_v0 }
  0xf9   : > { %v330_v30 = vpop.xlane.xlu0 %329 }
  0xfa   : > { %v334_v31 = vmul.f32 0.0078125, %v330_v30  ;;  %v3363_v30 = vsub.s32 %v694_v22, %v3322_v58 }
  0xfb   : > { %v339_v32 = vpop.xlane.xlu1 %338 }
  0xfc   : > { %v344_v33 = vmul.f32 %v334_v31, %v334_v31  ;;  %v342_v34 = vmul.f32 0.0078125, %v339_v32  ;;  %v348_v44 = vsub.f32 %v3289_v1, %v334_v31 }
  0xfd   : > { %v332_v35 = vpop.xlane.xlu0 %331 }
  0xfe   : > { %v346_v36 = vsub.f32 %v342_v34, %v344_v33  ;;  %v335_v37 = vmul.f32 0.0078125, %v332_v35 }
  0xff   : > { %v341_v38 = vpop.xlane.xlu1 %340 }
 0x100   : > { %v350_v39 = vadd.f32 1e-05, %v346_v36  ;;  %v345_v40 = vmul.f32 %v335_v37, %v335_v37  ;;  %v343_v41 = vmul.f32 0.0078125, %v341_v38  ;;  %v349_v48 = vsub.f32 %v3291_v2, %v335_v37 }
 0x102   : > { %2848 = vrsqrt.f32 %v350_v39  ;;  %v347_v42 = vsub.f32 %v343_v41, %v345_v40 }
 0x104   : > { %v351_v43 = vadd.f32 1e-05, %v347_v42 }
 0x106   : > { %2850 = vrsqrt.f32 %v351_v43 }
 0x10c   : > { %v2849_v45 = vpop.eup %2848 }
 0x10d   : > { %v354_v46 = vmul.f32 %v2849_v45, %v348_v44 }
 0x10f   : > { %v363_v51 = vmul.f32 %v2522_v47, %v354_v46 }
 0x110   : > { %v2851_v49 = vpop.eup %2850 }
 0x111   : > { %v355_v50 = vmul.f32 %v2851_v49, %v349_v48  ;;  %v372_v54 = vadd.f32 %v2523_v52, %v363_v51 }
 0x113   : > { %v364_v53 = vmul.f32 %v2522_v47, %v355_v50 }
 0x115   : > { %v373_v55 = vadd.f32 %v2523_v52, %v364_v53 }
 0x117   : > { %v374_v56 = vpack.c.bf16 %v373_v55, %v372_v54 }
 0x119   : > { %585 = vmatmul.mubr.bf16.vlgmr.msra.gmra.mrb[0].mxu0 %v374_v56  ;;  %2639 = vmatmul.mubr.bf16.vlgmr.msra.gmra.mrb[0].mxu1 %v374_v56 }
 0x11a   : > { %2644 = vmatprep.mubr.msk.bf16.mxu1 %vm3053_vm0, %v3051_v0  ;;  %2668 = vmatprep.mubr.msk.bf16.mxu0 %vm3053_vm0, %v3051_v0 }
 0x1ec   : > { %v586_v63 = vpop.f32.mrb[0].mxu0  ;;  %v3332_v1 = vpop.f32.mrb[0].mxu1 }
 0x1ed   : > { %v588_v2 = vpop.f32.mrb[1].mxu0  ;;  %v2640_v3 = vpop.f32.mrb[1].mxu1  ;;  %v587_v10 = vadd.f32 %v586_v63, %v412_v4 }
 0x1ee   : > { %v589_v5 = vadd.f32 %v588_v2, %v416_v62  ;;  %v590_v6 = vpop.f32.mrb[2].mxu0  ;;  %v3335_v7 = vpop.f32.mrb[2].mxu1 }
 0x1ef   : > { %v592_v8 = vpop.f32.mrb[3].mxu0  ;;  %v2641_v9 = vpop.f32.mrb[3].mxu1  ;;  %v3341_v12 = vmul.f32 0.17677669, %v587_v10  ;;  %v591_v13 = vadd.f32 %v590_v6, %v412_v4 }
 0x1f0   : > { %942 = vrot.lane.b32.xlu1 %v589_v5, %s3054_s16  ;;  %936 = vrot.lane.b32.xlu0 %v589_v5, %s3055_s19  ;;  %v593_v11 = vadd.f32 %v592_v8, %v416_v62 }
 0x1f1   : > { %v3349_v14 = vmul.f32 0.17677669, %v591_v13 }
 0x1f4   : > { %938 = vrot.lane.b32.xlu1 %v593_v11, %s3055_s19  ;;  %948 = vrot.lane.b32.xlu0 %v589_v5, %s3056_s15 }
 0x1f8   : > { %944 = vrot.lane.b32.xlu1 %v593_v11, %s3054_s16  ;;  %640 = vrot.lane.b32.xlu0 %v3341_v12, %s3055_s19 }
 0x1fc   : > { %950 = vrot.lane.b32.xlu1 %v593_v11, %s3056_s15  ;;  %646 = vrot.lane.b32.xlu0 %v3341_v12, %s3054_s16 }
 0x200   : > { %642 = vrot.lane.b32.xlu1 %v3349_v14, %s3055_s19  ;;  %652 = vrot.lane.b32.xlu0 %v3341_v12, %s3056_s15 }
 0x204   : > { %648 = vrot.lane.b32.xlu1 %v3349_v14, %s3054_s16 }
 0x208   : > { %654 = vrot.lane.b32.xlu1 %v3349_v14, %s3056_s15 }
 0x262   : > { %v943_v20 = vpop.permute.xlu1 %942  ;;  %v937_v21 = vpop.permute.xlu0 %936 }
 0x263   : > { %v954_v24 = vcombine.low %v589_v5, %v943_v20  ;;  %v955_v25 = vcombine.high %v589_v5, %v943_v20 }
 0x265   : > { %v962_v31 = vrot.slane %v954_v24, %v3360_v23  ;;  %v969_v32 = vrot.slane %v955_v25, %v3360_v23 }
 0x266   : > { %v939_v26 = vpop.permute.xlu1 %938  ;;  %v949_v27 = vpop.permute.xlu0 %948 }
 0x267   : > { %v970_v28 = vcombine.low %v937_v21, %v949_v27  ;;  %v971_v29 = vcombine.high %v937_v21, %v949_v27 }
 0x269   : > { %v978_v33 = vrot.slane %v970_v28, %v3360_v23  ;;  %v985_v34 = vrot.slane %v971_v29, %v3360_v23 }
 0x26a   : > { %v945_v35 = vpop.permute.xlu1 %944  ;;  %v641_v36 = vpop.permute.xlu0 %640 }
 0x26b   : > { %v986_v37 = vcombine.low %v962_v31, %v978_v33  ;;  %v987_v38 = vcombine.high %v962_v31, %v978_v33  ;;  %v1002_v39 = vcombine.low %v969_v32, %v985_v34  ;;  %v1003_v40 = vcombine.high %v969_v32, %v985_v34 }
 0x26c   : > { %v1022_v41 = vcombine.low %v593_v11, %v945_v35  ;;  %v1023_v42 = vcombine.high %v593_v11, %v945_v35 }
 0x26d   : > { %v994_v43 = vrot.slane %v986_v37, %v3363_v30  ;;  %v1001_v44 = vrot.slane %v987_v38, %v3363_v30  ;;  %v1010_v45 = vrot.slane %v1002_v39, %v3363_v30  ;;  %v1017_v46 = vrot.slane %v1003_v40, %v3363_v30 }
 0x26e   : > { %v951_v47 = vpop.permute.xlu1 %950  ;;  %v647_v48 = vpop.permute.xlu0 %646  ;;  %v1030_v55 = vrot.slane %v1022_v41, %v3360_v23  ;;  %v1037_v56 = vrot.slane %v1023_v42, %v3360_v23 }
 0x26f   : > { %v1090_v49 = vcombine.low %v994_v43, %v1001_v44  ;;  %v2552_v50 = vcombine.high %v994_v43, %v1001_v44  ;;  %v1106_v51 = vcombine.low %v1010_v45, %v1017_v46  ;;  %v2553_v52 = vcombine.high %v1010_v45, %v1017_v46 }
 0x270   : > { %v1038_v53 = vcombine.low %v939_v26, %v951_v47  ;;  %v1039_v54 = vcombine.high %v939_v26, %v951_v47  ;;  %v658_v57 = vcombine.low %v3341_v12, %v647_v48  ;;  %v659_v59 = vcombine.high %v3341_v12, %v647_v48 }
 0x271   : > { %v3378_v61 = vrot.slane %v1090_v49, %v3360_v23  ;;  %v3381_v62 = vrot.slane %v2552_v50, %v3360_v23  ;;  %v3386_v5 = vrot.slane %v1106_v51, %v3360_v23  ;;  %v3389_v6 = vrot.slane %v2553_v52, %v3360_v23 }
 0x272   : > { %v1046_v63 = vrot.slane %v1038_v53, %v3360_v23  ;;  %v1053_v2 = vrot.slane %v1039_v54, %v3360_v23  ;;  %v643_v3 = vpop.permute.xlu1 %642  ;;  %v653_v4 = vpop.permute.xlu0 %652  ;;  %v666_v15 = vrot.slane %v658_v57, %v3360_v23  ;;  %v673_v16 = vrot.slane %v659_v59, %v3360_v23 }
 0x273   : > { %v674_v8 = vcombine.low %v641_v36, %v653_v4  ;;  %v675_v9 = vcombine.high %v641_v36, %v653_v4  ;;  %v1122_v35 = vcombine.low %v3378_v61, %v3381_v62  ;;  %v1138_v36 = vcombine.low %v3386_v5, %v3389_v6 }
 0x274   : > { %v1054_v10 = vcombine.low %v1030_v55, %v1046_v63  ;;  %v1055_v11 = vcombine.high %v1030_v55, %v1046_v63  ;;  %v1070_v12 = vcombine.low %v1037_v56, %v1053_v2  ;;  %v1071_v13 = vcombine.high %v1037_v56, %v1053_v2 }
 0x275   : > { %v682_v17 = vrot.slane %v674_v8, %v3360_v23  ;;  %v689_v18 = vrot.slane %v675_v9, %v3360_v23 }
 0x276   : > { %v1062_v19 = vrot.slane %v1054_v10, %v3363_v30  ;;  %v1069_v20 = vrot.slane %v1055_v11, %v3363_v30  ;;  %v1078_v21 = vrot.slane %v1070_v12, %v3363_v30  ;;  %v1085_v22 = vrot.slane %v1071_v13, %v3363_v30  ;;  %v649_v24 = vpop.permute.xlu1 %648 }
 0x277   : > { %v690_v25 = vcombine.low %v666_v15, %v682_v17  ;;  %v691_v26 = vcombine.high %v666_v15, %v682_v17  ;;  %v706_v27 = vcombine.low %v673_v16, %v689_v18  ;;  %v707_v28 = vcombine.high %v673_v16, %v689_v18 }
 0x278   : > { %v1158_v37 = vcombine.low %v1062_v19, %v1069_v20  ;;  %v2554_v38 = vcombine.high %v1062_v19, %v1069_v20  ;;  %v1174_v39 = vcombine.low %v1078_v21, %v1085_v22  ;;  %v2555_v40 = vcombine.high %v1078_v21, %v1085_v22 }
 0x279   : > { %v698_v29 = vrot.slane %v690_v25, %v3363_v30  ;;  %v705_v31 = vrot.slane %v691_v26, %v3363_v30  ;;  %v714_v32 = vrot.slane %v706_v27, %v3363_v30  ;;  %v721_v33 = vrot.slane %v707_v28, %v3363_v30 }
 0x27a   : > { %v655_v34 = vpop.permute.xlu1 %654  ;;  %v726_v41 = vcombine.low %v3349_v14, %v649_v24  ;;  %v727_v42 = vcombine.high %v3349_v14, %v649_v24  ;;  %v1165_v53 = vrot.slane %v1158_v37, %v3360_v23  ;;  %v1173_v54 = vrot.slane %v2554_v38, %v3360_v23 }
 0x27b   : > { %v742_v43 = vcombine.low %v643_v3, %v655_v34  ;;  %v743_v44 = vcombine.high %v643_v3, %v655_v34  ;;  %v794_v45 = vcombine.low %v698_v29, %v705_v31  ;;  %v2548_v46 = vcombine.high %v698_v29, %v705_v31 }
 0x27c   : > { %v810_v47 = vcombine.low %v714_v32, %v721_v33  ;;  %v2549_v48 = vcombine.high %v714_v32, %v721_v33  ;;  %v734_v49 = vrot.slane %v726_v41, %v3360_v23  ;;  %v741_v50 = vrot.slane %v727_v42, %v3360_v23 }
 0x27d   : > { %v750_v51 = vrot.slane %v742_v43, %v3360_v23  ;;  %v757_v52 = vrot.slane %v743_v44, %v3360_v23  ;;  %v1181_v14 = vrot.slane %v1174_v39, %v3360_v23  ;;  %v1189_v55 = vrot.slane %v2555_v40, %v3360_v23 }
 0x27e   : > { %v3418_v2 = vrot.slane %v794_v45, %v3360_v23  ;;  %v3421_v3 = vrot.slane %v2548_v46, %v3360_v23  ;;  %v3424_v4 = vrot.slane %v810_v47, %v3360_v23  ;;  %v3427_v8 = vrot.slane %v2549_v48, %v3360_v23 }
 0x27f   : > { %v758_v56 = vcombine.low %v734_v49, %v750_v51  ;;  %v759_v57 = vcombine.high %v734_v49, %v750_v51  ;;  %v774_v59 = vcombine.low %v741_v50, %v757_v52  ;;  %v775_v63 = vcombine.high %v741_v50, %v757_v52 }
 0x280   : > { %v1130_v13 = vrot.slane %v1122_v35, %v3363_v30  ;;  %v1146_v15 = vrot.slane %v1138_v36, %v3363_v30  ;;  %v1190_v16 = vcombine.low %v1165_v53, %v1173_v54  ;;  %v1206_v17 = vcombine.low %v1181_v14, %v1189_v55 }
 0x281   : > { %v766_v9 = vrot.slane %v758_v56, %v3363_v30  ;;  %v773_v10 = vrot.slane %v759_v57, %v3363_v30  ;;  %v782_v11 = vrot.slane %v774_v59, %v3363_v30  ;;  %v789_v12 = vrot.slane %v775_v63, %v3363_v30 }
 0x282   : > { %v826_v22 = vcombine.low %v3418_v2, %v3421_v3  ;;  %v842_v24 = vcombine.low %v3424_v4, %v3427_v8  ;;  %v1198_v25 = vrot.slane %v1190_v16, %v3363_v30  ;;  %v1214_v26 = vrot.slane %v1206_v17, %v3363_v30 }
 0x283   : > { %v862_v18 = vcombine.low %v766_v9, %v773_v10  ;;  %v2550_v19 = vcombine.high %v766_v9, %v773_v10  ;;  %v878_v20 = vcombine.low %v782_v11, %v789_v12  ;;  %v2551_v21 = vcombine.high %v782_v11, %v789_v12 }
 0x284   : > { %v1154_v32 = vcombine.low %v1130_v13, %v1146_v15  ;;  %v1222_v33 = vcombine.low %v1198_v25, %v1214_v26  ;;  %v834_v36 = vrot.slane %v826_v22, %v3363_v30  ;;  %v850_v37 = vrot.slane %v842_v24, %v3363_v30 }
 0x285   : > { %v869_v27 = vrot.slane %v862_v18, %v3360_v23  ;;  %v877_v28 = vrot.slane %v2550_v19, %v3360_v23  ;;  %v885_v29 = vrot.slane %v878_v20, %v3360_v23  ;;  %v893_v31 = vrot.slane %v2551_v21, %v3360_v23 }
 0x286   : > { %v1226_v38 = vpack.c.bf16 %v1222_v33, %v1154_v32  ;;  %v1223_v42 = vcombine.high %v1198_v25, %v1214_v26  ;;  %v1191_v43 = vcombine.high %v1165_v53, %v1173_v54  ;;  %v1207_v45 = vcombine.high %v1181_v14, %v1189_v55 }
 0x287   : > { %v894_v34 = vcombine.low %v869_v27, %v877_v28  ;;  %v910_v35 = vcombine.low %v885_v29, %v893_v31  ;;  %v858_v46 = vcombine.low %v834_v36, %v850_v37  ;;  %v1155_v47 = vcombine.high %v1130_v13, %v1146_v15 }
 0x288   : > { %v1531_v41 = vsel %vm1526_vm1, %v1226_v38, 0  ;;  %v1123_v48 = vcombine.high %v3378_v61, %v3381_v62  ;;  %v1139_v49 = vcombine.high %v3386_v5, %v3389_v6  ;;  %v1205_v52 = vrot.slane %v1191_v43, %v3363_v30 }
 0x289   : > { %v902_v39 = vrot.slane %v894_v34, %v3363_v30  ;;  %v918_v40 = vrot.slane %v910_v35, %v3363_v30  ;;  %2643 = vmatpush3.bf16.xpose.msra.mxu1 %v1531_v41  ;;  %v1227_v51 = vpack.c.bf16 %v1223_v42, %v1155_v47  ;;  %v1221_v56 = vrot.slane %v1207_v45, %v3363_v30 }
 0x28a   : > { %2648 = vmatprep.subr.bf16.mxu1 %v3051_v0  ;;  %v1137_v53 = vrot.slane %v1123_v48, %v3363_v30  ;;  %v1153_v54 = vrot.slane %v1139_v49, %v3363_v30  ;;  %v895_v61 = vcombine.high %v869_v27, %v877_v28  ;;  %v911_v62 = vcombine.high %v885_v29, %v893_v31 }
 0x28b   : > { %v926_v44 = vcombine.low %v902_v39, %v918_v40  ;;  %v1578_v14 = vsel %vm1526_vm1, %v1227_v51, 0  ;;  %v1224_v55 = vcombine.low %v1205_v52, %v1221_v56  ;;  %v927_v5 = vcombine.high %v902_v39, %v918_v40 }
 0x28c   : > { %v1156_v6 = vcombine.low %v1137_v53, %v1153_v54  ;;  %v827_v57 = vcombine.high %v3418_v2, %v3421_v3  ;;  %v843_v59 = vcombine.high %v3424_v4, %v3427_v8  ;;  %v859_v63 = vcombine.high %v834_v36, %v850_v37 }
 0x28d   : > { %v930_v50 = vpack.c.bf16 %v926_v44, %v858_v46  ;;  %v909_v10 = vrot.slane %v895_v61, %v3363_v30  ;;  %v925_v11 = vrot.slane %v911_v62, %v3363_v30  ;;  %v1225_v17 = vcombine.high %v1205_v52, %v1221_v56 }
 0x28e   : > { %v1228_v9 = vpack.c.bf16 %v1224_v55, %v1156_v6  ;;  %v931_v12 = vpack.c.bf16 %v927_v5, %v859_v63  ;;  %v841_v13 = vrot.slane %v827_v57, %v3363_v30  ;;  %v857_v15 = vrot.slane %v843_v59, %v3363_v30 }
 0x28f   : > { %v928_v2 = vcombine.low %v909_v10, %v925_v11  ;;  %v1157_v3 = vcombine.high %v1137_v53, %v1153_v54  ;;  %v929_v20 = vcombine.high %v909_v10, %v925_v11  ;;  %v419_v48 = vsub.s32 2, %v3322_v58 }
 0x290   : > { %2645 = vmatmul.mubr.msk.bf16.vlgmr.msra.gmra.mrb[4].mxu1 %vm1526_vm1, %v930_v50  ;;  %v1625_v16 = vsel %vm1526_vm1, %v1228_v9, 0  ;;  %v860_v4 = vcombine.low %v841_v13, %v857_v15  ;;  %v861_v21 = vcombine.high %v841_v13, %v857_v15 }
 0x291   : > { %2649 = vmatpush3.bf16.xpose.msra.mxu1 %v1578_v14  ;;  %2650 = vmatprep.mubr.msk.bf16.mxu1 %vm3053_vm0, %v3051_v0  ;;  %v1229_v8 = vpack.c.bf16 %v1225_v17, %v1157_v3  ;;  %v420_v49 = vrot.slane %v3328_v60, %v419_v48 }
 0x292   : > { %2654 = vmatprep.subr.bf16.mxu1 %v3051_v0  ;;  %v932_v18 = vpack.c.bf16 %v928_v2, %v860_v4  ;;  %v933_v22 = vpack.c.bf16 %v929_v20, %v861_v21 }
 0x293   : > { %v1672_v19 = vsel %vm1526_vm1, %v1229_v8, 0  ;;  %v3500_v50 = vadd.f32 %v3335_v7, %v420_v49  ;;  %v3505_v51 = vadd.f32 %v3332_v1, %v420_v49 }
 0x298   : > { %2651 = vmatmul.mubr.msk.bf16.vlgmr.msra.gmra.mrb[8].mxu1 %vm1526_vm1, %v931_v12 }
 0x299   : > { %2655 = vmatpush3.bf16.xpose.msra.mxu1 %v1625_v16  ;;  %2656 = vmatprep.mubr.msk.bf16.mxu1 %vm3053_vm0, %v3051_v0 }
 0x29a   : > { %2660 = vmatprep.subr.bf16.mxu1 %v3051_v0 }
 0x2a0   : > { %2657 = vmatmul.mubr.msk.bf16.vlgmr.msra.gmra.mrb[12].mxu1 %vm1526_vm1, %v932_v18 }
 0x2a1   : > { %2661 = vmatpush3.bf16.xpose.msra.mxu1 %v1672_v19  ;;  %2662 = vmatprep.mubr.msk.bf16.mxu1 %vm3053_vm0, %v3051_v0 }
 0x2a2   : > { %2672 = vmatprep.subr.bf16.mxu1 %v3051_v0 }
 0x2a8   : > { %2663 = vmatmul.mubr.msk.bf16.vlgmr.msra.gmra.mrb[16].mxu1 %vm1526_vm1, %v933_v22 }
 0x2a9   : > { %2674 = vmatprep.mubr.msk.bf16.mxu1 %vm3053_vm0, %v3051_v0 }
 0x363   : > { %v1567_v24 = vpop.f32.mrb[4].mxu1 }
 0x364   : > { %v2646_v25 = vpop.f32.mrb[5].mxu1  ;;  %v1716_v26 = vsel %vm1715_vm2, %v1567_v24, -inf }
 0x365   : > { %1717 = vmax.xlane.f32.xlu0 %v1716_v26  ;;  %v1570_v27 = vpop.f32.mrb[6].mxu1 }
 0x366   : > { %v2647_v28 = vpop.f32.mrb[7].mxu1  ;;  %v1719_v29 = vsel %vm1715_vm2, %v1570_v27, -inf }
 0x367   : > { %1720 = vmax.xlane.f32.xlu1 %v1719_v29 }
 0x36b   : > { %v1614_v31 = vpop.f32.mrb[8].mxu1 }
 0x36c   : > { %v2652_v32 = vpop.f32.mrb[9].mxu1  ;;  %v1722_v33 = vsel %vm1715_vm2, %v1614_v31, -inf }
 0x36d   : > { %1723 = vmax.xlane.f32.xlu0 %v1722_v33  ;;  %v1617_v34 = vpop.f32.mrb[10].mxu1 }
 0x36e   : > { %v2653_v35 = vpop.f32.mrb[11].mxu1  ;;  %v1725_v36 = vsel %vm1715_vm2, %v1617_v34, -inf }
 0x371   : > { %1726 = vmax.xlane.f32.xlu0 %v1725_v36 }
 0x373   : > { %v1661_v37 = vpop.f32.mrb[12].mxu1 }
 0x374   : > { %v2658_v38 = vpop.f32.mrb[13].mxu1  ;;  %v1728_v39 = vsel %vm1715_vm2, %v1661_v37, -inf }
 0x375   : > { %1729 = vmax.xlane.f32.xlu0 %v1728_v39  ;;  %v3490_v40 = vpop.f32.mrb[14].mxu1 }
 0x376   : > { %v2659_v41 = vpop.f32.mrb[15].mxu1  ;;  %v1731_v42 = vsel %vm1715_vm2, %v3490_v40, -inf }
 0x377   : > { %1732 = vmax.xlane.f32.xlu1 %v1731_v42 }
 0x37b   : > { %v1708_v43 = vpop.f32.mrb[16].mxu1 }
 0x37c   : > { %v2664_v44 = vpop.f32.mrb[17].mxu1  ;;  %v1734_v45 = vsel %vm1715_vm2, %v1708_v43, -inf }
 0x37d   : > { %1735 = vmax.xlane.f32.xlu0 %v1734_v45  ;;  %v3495_v46 = vpop.f32.mrb[18].mxu1 }
 0x37e   : > { %v2665_v47 = vpop.f32.mrb[19].mxu1  ;;  %v1737_v58 = vsel %vm1715_vm2, %v3495_v46, -inf }
 0x388   : > { %1234 = vrot.lane.b32.xlu1 %v3500_v50, %s3055_s19 }
 0x38c   : > { %1238 = vrot.lane.b32.xlu1 %v3505_v51, %s3054_s16 }
 0x393   : > { %1232 = vrot.lane.b32.xlu0 %v3505_v51, %s3055_s19 }
 0x397   : > { %1244 = vrot.lane.b32.xlu0 %v3505_v51, %s3056_s15 }
 0x3b0   : > { %1738 = vmax.xlane.f32.xlu1 %v1737_v58 }
 0x3c1   : > { %1240 = vrot.lane.b32.xlu1 %v3500_v50, %s3054_s16 }
 0x3f2   : > { %v1718_v60 = vpop.xlane.xlu0 %1717 }
 0x3f3   : > { %v1740_v7 = vsub.f32 %v1567_v24, %v1718_v60 }
 0x3f4   : > { %v1721_v1 = vpop.xlane.xlu1 %1720 }
 0x3f5   : > { %v1748_v52 = vmul.f32 1.442695, %v1740_v7  ;;  %v1741_v56 = vsub.f32 %v1570_v27, %v1721_v1 }
 0x3f7   : > { %2852 = vpow2.f32 %v1748_v52  ;;  %v1750_v53 = vmul.f32 1.442695, %v1741_v56 }
 0x3f9   : > { %2854 = vpow2.f32 %v1750_v53 }
 0x3fa   : > { %v1724_v54 = vpop.xlane.xlu0 %1723 }
 0x3fb   : > { %v1742_v14 = vsub.f32 %v1614_v31, %v1724_v54 }
 0x3fd   : > { %v1752_v55 = vmul.f32 1.442695, %v1742_v14 }
 0x3fe   : > { %v1727_v61 = vpop.xlane.xlu0 %1726 }
 0x3ff   : > { %2856 = vpow2.f32 %v1752_v55  ;;  %v1743_v62 = vsub.f32 %v1617_v34, %v1727_v61 }
 0x401   : > { %v3517_v5 = vpop.eup %2852  ;;  %v1754_v6 = vmul.f32 1.442695, %v1743_v62 }
 0x402   : > { %v1730_v57 = vpop.xlane.xlu0 %1729  ;;  %v1764_v59 = vsel %vm1715_vm2, %v3517_v5, 0.0 }
 0x403   : > { %v3521_v63 = vpop.eup %2854  ;;  %2858 = vpow2.f32 %v1754_v6  ;;  %v1744_v9 = vsub.f32 %v1661_v37, %v1730_v57  ;;  %1765 = vadd.xlane.f32.xlu0 %v1764_v59 }
 0x404   : > { %v1767_v10 = vsel %vm1715_vm2, %v3521_v63, 0.0  ;;  %v1733_v20 = vpop.xlane.xlu1 %1732 }
 0x405   : > { %v1756_v11 = vmul.f32 1.442695, %v1744_v9  ;;  %1768 = vadd.xlane.f32.xlu1 %v1767_v10  ;;  %v1745_v21 = vsub.f32 %v3490_v40, %v1733_v20 }
 0x407   : > { %2860 = vpow2.f32 %v1756_v11  ;;  %v1758_v22 = vmul.f32 1.442695, %v1745_v21 }
 0x408   : > { %v1235_v24 = vpop.permute.xlu1 %1234 }
 0x409   : > { %v3525_v12 = vpop.eup %2856 }
 0x40a   : > { %v1736_v13 = vpop.xlane.xlu0 %1735  ;;  %v1770_v15 = vsel %vm1715_vm2, %v3525_v12, 0.0 }
 0x40b   : > { %v1746_v16 = vsub.f32 %v1708_v43, %v1736_v13  ;;  %1771 = vadd.xlane.f32.xlu0 %v1770_v15 }
 0x40c   : > { %v1239_v25 = vpop.permute.xlu1 %1238 }
 0x40d   : > { %v3529_v17 = vpop.eup %2858  ;;  %v1760_v2 = vmul.f32 1.442695, %v1746_v16  ;;  %v1250_v37 = vcombine.low %v3505_v51, %v1239_v25  ;;  %v1251_v39 = vcombine.high %v3505_v51, %v1239_v25 }
 0x40e   : > { %v1773_v3 = vsel %vm1715_vm2, %v3529_v17, 0.0  ;;  %v1233_v34 = vpop.permute.xlu0 %1232 }
 0x40f   : > { %2862 = vpow2.f32 %v1760_v2  ;;  %1774 = vadd.xlane.f32.xlu1 %v1773_v3  ;;  %v1258_v41 = vrot.slane %v1250_v37, %v3360_v23  ;;  %v1265_v44 = vrot.slane %v1251_v39, %v3360_v23 }
 0x410   : > { %2864 = vpow2.f32 %v1758_v22 }
 0x411   : > { %v3533_v4 = vpop.eup %2860 }
 0x412   : > { %v1776_v8 = vsel %vm1715_vm2, %v3533_v4, 0.0  ;;  %v1245_v35 = vpop.permute.xlu0 %1244 }
 0x413   : > { %1777 = vadd.xlane.f32.xlu0 %v1776_v8  ;;  %v1266_v36 = vcombine.low %v1233_v34, %v1245_v35  ;;  %v1267_v38 = vcombine.high %v1233_v34, %v1245_v35 }
 0x415   : > { %v1274_v40 = vrot.slane %v1266_v36, %v3360_v23  ;;  %v1281_v42 = vrot.slane %v1267_v38, %v3360_v23 }
 0x417   : > { %v1282_v45 = vcombine.low %v1258_v41, %v1274_v40  ;;  %v1298_v47 = vcombine.low %v1265_v44, %v1281_v42  ;;  %v1299_v48 = vcombine.high %v1265_v44, %v1281_v42 }
 0x419   : > { %v3537_v18 = vpop.eup %2862  ;;  %v1290_v58 = vrot.slane %v1282_v45, %v3363_v30  ;;  %v1306_v51 = vrot.slane %v1298_v47, %v3363_v30  ;;  %v1313_v7 = vrot.slane %v1299_v48, %v3363_v30 }
 0x41a   : > { %v1782_v19 = vsel %vm1715_vm2, %v3537_v18, 0.0  ;;  %v3545_v28 = vpop.eup %2864 }
 0x41b   : > { %1783 = vadd.xlane.f32.xlu0 %v1782_v19  ;;  %v1779_v31 = vsel %vm1715_vm2, %v3545_v28, 0.0  ;;  %v1402_v55 = vcombine.low %v1306_v51, %v1313_v7  ;;  %v2557_v61 = vcombine.high %v1306_v51, %v1313_v7 }
 0x41d   : > { %v1409_v16 = vrot.slane %v1402_v55, %v3360_v23  ;;  %v1417_v2 = vrot.slane %v2557_v61, %v3360_v23 }
 0x420   : > { %1246 = vrot.lane.b32.xlu1 %v3500_v50, %s3056_s15 }
 0x43d   : > { %v1739_v26 = vpop.xlane.xlu1 %1738 }
 0x43e   : > { %v1747_v27 = vsub.f32 %v3495_v46, %v1739_v26  ;;  %v1283_v46 = vcombine.high %v1258_v41, %v1274_v40 }
 0x440   : > { %v1762_v29 = vmul.f32 1.442695, %v1747_v27  ;;  %v1297_v60 = vrot.slane %v1283_v46, %v3363_v30  ;;  %v1434_v27 = vcombine.low %v1409_v16, %v1417_v2 }
 0x441   : > { %v1241_v43 = vpop.permute.xlu1 %1240 }
 0x442   : > { %2866 = vpow2.f32 %v1762_v29  ;;  %v1386_v52 = vcombine.low %v1290_v58, %v1297_v60  ;;  %v1318_v56 = vcombine.low %v3500_v50, %v1241_v43  ;;  %v1319_v53 = vcombine.high %v3500_v50, %v1241_v43 }
 0x443   : > { %v2556_v14 = vcombine.high %v1290_v58, %v1297_v60  ;;  %v1442_v41 = vrot.slane %v1434_v27, %v3363_v30  ;;  %v1435_v43 = vcombine.high %v1409_v16, %v1417_v2 }
 0x444   : > { %1780 = vadd.xlane.f32.xlu1 %v1779_v31  ;;  %v1393_v59 = vrot.slane %v1386_v52, %v3360_v23  ;;  %v1326_v9 = vrot.slane %v1318_v56, %v3360_v23  ;;  %v1333_v10 = vrot.slane %v1319_v53, %v3360_v23 }
 0x445   : > { %v1401_v15 = vrot.slane %v2556_v14, %v3360_v23  ;;  %v1449_v56 = vrot.slane %v1435_v43, %v3363_v30 }
 0x447   : > { %v1418_v26 = vcombine.low %v1393_v59, %v1401_v15  ;;  %v1419_v42 = vcombine.high %v1393_v59, %v1401_v15 }
 0x449   : > { %v1426_v40 = vrot.slane %v1418_v26, %v3363_v30  ;;  %v1433_v52 = vrot.slane %v1419_v42, %v3363_v30 }
 0x44b   : > { %v1450_v53 = vcombine.low %v1426_v40, %v1442_v41  ;;  %v1451_v14 = vcombine.high %v1426_v40, %v1442_v41 }
 0x44c   : > { %v3549_v32 = vpop.eup %2866 }
 0x44d   : > { %v1785_v33 = vsel %vm1715_vm2, %v3549_v32, 0.0 }
 0x44e   : > { %1786 = vadd.xlane.f32.xlu0 %v1785_v33 }
 0x490   : > { %v1766_v54 = vpop.xlane.xlu0 %1765 }
 0x491   : > { %2868 = vrcp.f32 %v1766_v54 }
 0x492   : > { %v1769_v49 = vpop.xlane.xlu1 %1768 }
 0x493   : > { %2870 = vrcp.f32 %v1769_v49 }
 0x498   : > { %v1772_v11 = vpop.xlane.xlu0 %1771 }
 0x49b   : > { %v2869_v39 = vpop.eup %2868 }
 0x49c   : > { %v1775_v1 = vpop.xlane.xlu1 %1774 }
 0x49d   : > { %2872 = vrcp.f32 %v1775_v1  ;;  %v2871_v44 = vpop.eup %2870 }
 0x49e   : > { %2874 = vrcp.f32 %v1772_v11  ;;  %v1797_v61 = vmul.f32 %v2871_v44, %v3521_v63 }
 0x4a0   : > { %v1247_v62 = vpop.permute.xlu1 %1246 }
 0x4a1   : > { %v1334_v6 = vcombine.low %v1235_v24, %v1247_v62  ;;  %v1335_v57 = vcombine.high %v1235_v24, %v1247_v62 }
 0x4a3   : > { %v1342_v13 = vrot.slane %v1334_v6, %v3360_v23  ;;  %v1349_v50 = vrot.slane %v1335_v57, %v3360_v23 }
 0x4a5   : > { %v1350_v3 = vcombine.low %v1326_v9, %v1342_v13  ;;  %v1351_v8 = vcombine.high %v1326_v9, %v1342_v13  ;;  %v1366_v19 = vcombine.low %v1333_v10, %v1349_v50  ;;  %v1367_v20 = vcombine.high %v1333_v10, %v1349_v50 }
 0x4a6   : > { %v1796_v10 = vmul.f32 %v2869_v39, %v3517_v5  ;;  %v1452_v13 = vcombine.low %v1433_v52, %v1449_v56  ;;  %v1453_v50 = vcombine.high %v1433_v52, %v1449_v56  ;;  %v1778_v5 = vpop.xlane.xlu0 %1777 }
 0x4a7   : > { %v1358_v21 = vrot.slane %v1350_v3, %v3363_v30  ;;  %v1365_v22 = vrot.slane %v1351_v8, %v3363_v30  ;;  %v1374_v24 = vrot.slane %v1366_v19, %v3363_v30  ;;  %v1381_v25 = vrot.slane %v1367_v20, %v3363_v30  ;;  %v2873_v49 = vpop.eup %2872 }
 0x4a8   : > { %v2875_v1 = vpop.eup %2874  ;;  %v1799_v62 = vmul.f32 %v2873_v49, %v3529_v17  ;;  %v1804_v15 = vpack.c.bf16 %v1797_v61, %v1796_v10  ;;  %2876 = vrcp.f32 %v1778_v5 }
 0x4a9   : > { %v1454_v29 = vcombine.low %v1358_v21, %v1365_v22  ;;  %v2558_v31 = vcombine.high %v1358_v21, %v1365_v22  ;;  %v1470_v33 = vcombine.low %v1374_v24, %v1381_v25  ;;  %v2559_v34 = vcombine.high %v1374_v24, %v1381_v25 }
 0x4aa   : > { %v1798_v11 = vmul.f32 %v2875_v1, %v3525_v12  ;;  %v1784_v2 = vpop.xlane.xlu0 %1783 }
 0x4ab   : > { %v1461_v35 = vrot.slane %v1454_v29, %v3360_v23  ;;  %v1469_v36 = vrot.slane %v2558_v31, %v3360_v23  ;;  %v1477_v37 = vrot.slane %v1470_v33, %v3360_v23  ;;  %v1485_v38 = vrot.slane %v2559_v34, %v3360_v23  ;;  %v2840_v31 = vld [vmem:[#allocation7] sm:$0xff]   ;;  %v2843_v33 = vld [vmem:[#allocation7 + $0x18] sm:$0xff]  }
 0x4ac   : > { %v1805_v16 = vpack.c.bf16 %v1799_v62, %v1798_v11 }
 0x4ad   : > { %v1486_v45 = vcombine.low %v1461_v35, %v1469_v36  ;;  %v1502_v46 = vcombine.low %v1477_v37, %v1485_v38  ;;  %v1487_v47 = vcombine.high %v1461_v35, %v1469_v36  ;;  %v1503_v48 = vcombine.high %v1477_v37, %v1485_v38 }
 0x4af   : > { %v1494_v58 = vrot.slane %v1486_v45, %v3363_v30  ;;  %v1510_v60 = vrot.slane %v1502_v46, %v3363_v30  ;;  %v1501_v51 = vrot.slane %v1487_v47, %v3363_v30  ;;  %v1517_v7 = vrot.slane %v1503_v48, %v3363_v30 }
 0x4b1   : > { %v1518_v54 = vcombine.low %v1494_v58, %v1510_v60  ;;  %v1519_v55 = vcombine.high %v1494_v58, %v1510_v60  ;;  %v1520_v59 = vcombine.low %v1501_v51, %v1517_v7  ;;  %v1521_v9 = vcombine.high %v1501_v51, %v1517_v7 }
 0x4b2   : > { %v2877_v3 = vpop.eup %2876 }
 0x4b3   : > { %v1522_v6 = vpack.c.bf16 %v1518_v54, %v1450_v53  ;;  %v1523_v57 = vpack.c.bf16 %v1519_v55, %v1451_v14  ;;  %v1524_v63 = vpack.c.bf16 %v1520_v59, %v1452_v13  ;;  %v1525_v17 = vpack.c.bf16 %v1521_v9, %v1453_v50 }
 0x4b4   : > { %v1800_v20 = vmul.f32 %v2877_v3, %v3533_v4  ;;  %v2841_v4 = vld [vmem:[#allocation7 + $0x8] sm:$0xff]  }
 0x4b5   : > { %2667 = vmatpush3.bf16.msra.mxu0 %v1522_v6  ;;  %2673 = vmatpush3.bf16.msra.mxu1 %v1523_v57 }
 0x4b6   : > { %2678 = vmatprep.subr.bf16.mxu0 %v3051_v0  ;;  %2684 = vmatprep.subr.bf16.mxu1 %v3051_v0 }
 0x4b8   : > { %2669 = vmatmul.mubr.msk.bf16.vlgmr.msra.gmra.mrb[4].mxu0 %vm1715_vm2, %v1804_v15  ;;  %2675 = vmatmul.mubr.msk.bf16.vlgmr.msra.gmra.mrb[20].mxu1 %vm1715_vm2, %v1805_v16 }
 0x4b9   : > { %2679 = vmatpush3.bf16.msra.mxu0 %v1524_v63  ;;  %2685 = vmatpush3.bf16.msra.mxu1 %v1525_v17 }
 0x4ba   : > { %2680 = vmatprep.mubr.msk.bf16.mxu0 %vm3053_vm0, %v3051_v0  ;;  %2686 = vmatprep.mubr.msk.bf16.mxu1 %vm3053_vm0, %v3051_v0 }
 0x4bb   : > { %2690 = vmatprep.subr.bf16.mxu0 %v3051_v0 }
 0x4d1   : > { %v1781_v12 = vpop.xlane.xlu1 %1780 }
 0x4d2   : > { %2878 = vrcp.f32 %v1781_v12 }
 0x4d3   : > { %2880 = vrcp.f32 %v1784_v2 }
 0x4db   : > { %v1787_v8 = vpop.xlane.xlu0 %1786 }
 0x4dc   : > { %v2879_v19 = vpop.eup %2878  ;;  %2882 = vrcp.f32 %v1787_v8 }
 0x4dd   : > { %v1801_v21 = vmul.f32 %v2879_v19, %v3545_v28  ;;  %v2881_v24 = vpop.eup %2880  ;;  %v2842_v28 = vld [vmem:[#allocation7 + $0x10] sm:$0xff]  }
 0x4de   : > { %v1802_v26 = vmul.f32 %v2881_v24, %v3537_v18  ;;  %v2844_v18 = vld [vmem:[#allocation7 + $0x20] sm:$0xff]  }
 0x4df   : > { %v1806_v22 = vpack.c.bf16 %v1801_v21, %v1800_v20 }
 0x4e1   : > { %2681 = vmatmul.mubr.msk.bf16.vlgmr.msra.gmra.mrb[8].mxu0 %vm1715_vm2, %v1806_v22 }
 0x4e2   : > { %2706 = vmatprep.mubr.msk.bf16.mxu0 %vm3053_vm0, %v3051_v0  ;;  %2691 = vmatpush3.bf16.msra.mxu0 %v2840_v31 }
 0x4e3   : > { %2692 = vmatprep.subr.bf16.mxu0 %v3051_v0 }
 0x4e6   : > { %v2883_v25 = vpop.eup %2882  ;;  %2693 = vmatpush3.bf16.msra.mxu0 %v2841_v4 }
 0x4e7   : > { %v1803_v27 = vmul.f32 %v2883_v25, %v3549_v32  ;;  %2694 = vmatprep.subr.bf16.mxu0 %v3051_v0  ;;  %v2845_v32 = vld [vmem:[#allocation7 + $0x28] sm:$0xff]  }
 0x4e9   : > { %v1807_v29 = vpack.c.bf16 %v1803_v27, %v1802_v26 }
 0x4ea   : > { %2695 = vmatpush3.bf16.msra.mxu0 %v2842_v28 }
 0x4eb   : > { %2687 = vmatmul.mubr.msk.bf16.vlgmr.msra.gmra.mrb[24].mxu1 %vm1715_vm2, %v1807_v29  ;;  %2696 = vmatprep.subr.bf16.mxu0 %v3051_v0 }
 0x4ee   : > { %2697 = vmatpush3.bf16.msra.mxu0 %v2843_v33 }
 0x4ef   : > { %2698 = vmatprep.subr.bf16.mxu0 %v3051_v0 }
 0x4f2   : > { %2699 = vmatpush3.bf16.msra.mxu0 %v2844_v18 }
 0x4f3   : > { %2700 = vmatprep.subr.bf16.mxu0 %v3051_v0 }
 0x4f6   : > { %2701 = vmatpush3.bf16.msra.mxu0 %v2845_v32 }
 0x4f7   : > { %2702 = vmatprep.subr.bf16.mxu0 %v3051_v0 }
 0x58b   : > { %v1845_v34 = vpop.f32.mrb[4].mxu0  ;;  %v1889_v35 = vpop.f32.mrb[20].mxu1 }
 0x58c   : > { %v2670_v36 = vpop.f32.mrb[5].mxu0  ;;  %v2676_v37 = vpop.f32.mrb[21].mxu1 }
 0x58d   : > { %v1848_v38 = vpop.f32.mrb[6].mxu0  ;;  %v1892_v39 = vpop.f32.mrb[22].mxu1  ;;  %v2846_v37 = vld [vmem:[#allocation7 + $0x30] sm:$0xff]  }
 0x58e   : > { %v2671_v40 = vpop.f32.mrb[7].mxu0  ;;  %v2677_v41 = vpop.f32.mrb[23].mxu1  ;;  %2703 = vmatpush3.bf16.msra.mxu0 %v2846_v37 }
 0x58f   : > { %2704 = vmatprep.subr.bf16.mxu0 %v3051_v0 }
 0x5b4   : > { %v1933_v42 = vpop.f32.mrb[8].mxu0 }
 0x5b5   : > { %v1984_v43 = vcombine.low %v1845_v34, %v1933_v42  ;;  %v1985_v44 = vcombine.high %v1845_v34, %v1933_v42  ;;  %v2682_v45 = vpop.f32.mrb[9].mxu0 }
 0x5b6   : > { %v1936_v46 = vpop.f32.mrb[10].mxu0 }
 0x5b7   : > { %v2052_v47 = vcombine.low %v1848_v38, %v1936_v46  ;;  %v2053_v48 = vcombine.high %v1848_v38, %v1936_v46  ;;  %v2683_v49 = vpop.f32.mrb[11].mxu0  ;;  %v1992_v1 = vrot.slane %v1984_v43, %v3360_v23  ;;  %v1999_v52 = vrot.slane %v1985_v44, %v3360_v23 }
 0x5b9   : > { %v2060_v9 = vrot.slane %v2052_v47, %v3360_v23  ;;  %v2067_v10 = vrot.slane %v2053_v48, %v3360_v23 }
 0x5be   : > { %v1977_v58 = vpop.f32.mrb[24].mxu1 }
 0x5bf   : > { %v2000_v60 = vcombine.low %v1889_v35, %v1977_v58  ;;  %v2001_v51 = vcombine.high %v1889_v35, %v1977_v58  ;;  %v2688_v7 = vpop.f32.mrb[25].mxu1 }
 0x5c0   : > { %v1980_v56 = vpop.f32.mrb[26].mxu1 }
 0x5c1   : > { %v2008_v53 = vrot.slane %v2000_v60, %v3360_v23  ;;  %v2015_v54 = vrot.slane %v2001_v51, %v3360_v23  ;;  %v2068_v14 = vcombine.low %v1892_v39, %v1980_v56  ;;  %v2069_v55 = vcombine.high %v1892_v39, %v1980_v56  ;;  %v2689_v61 = vpop.f32.mrb[27].mxu1 }
 0x5c3   : > { %v2016_v62 = vcombine.low %v1992_v1, %v2008_v53  ;;  %v2017_v6 = vcombine.high %v1992_v1, %v2008_v53  ;;  %v2032_v57 = vcombine.low %v1999_v52, %v2015_v54  ;;  %v2033_v59 = vcombine.high %v1999_v52, %v2015_v54  ;;  %v2847_v53 = vld [vmem:[#allocation7 + $0x38] sm:$0xff]  }
 0x5c4   : > { %v2076_v11 = vrot.slane %v2068_v14, %v3360_v23  ;;  %v2083_v13 = vrot.slane %v2069_v55, %v3360_v23  ;;  %2705 = vmatpush3.bf16.msra.mxu0 %v2847_v53 }
 0x5c5   : > { %v2024_v50 = vrot.slane %v2016_v62, %v3363_v30  ;;  %v2031_v15 = vrot.slane %v2017_v6, %v3363_v30  ;;  %v2040_v16 = vrot.slane %v2032_v57, %v3363_v30  ;;  %v2047_v63 = vrot.slane %v2033_v59, %v3363_v30 }
 0x5c6   : > { %v2084_v17 = vcombine.low %v2060_v9, %v2076_v11  ;;  %v2085_v5 = vcombine.high %v2060_v9, %v2076_v11  ;;  %v2100_v12 = vcombine.low %v2067_v10, %v2083_v13  ;;  %v2101_v2 = vcombine.high %v2067_v10, %v2083_v13 }
 0x5c7   : > { %v2120_v3 = vcombine.low %v2024_v50, %v2031_v15  ;;  %v2568_v8 = vcombine.high %v2024_v50, %v2031_v15  ;;  %v2136_v19 = vcombine.low %v2040_v16, %v2047_v63  ;;  %v2569_v20 = vcombine.high %v2040_v16, %v2047_v63 }
 0x5c8   : > { %v2092_v21 = vrot.slane %v2084_v17, %v3363_v30  ;;  %v2099_v22 = vrot.slane %v2085_v5, %v3363_v30  ;;  %v2108_v24 = vrot.slane %v2100_v12, %v3363_v30  ;;  %v2115_v25 = vrot.slane %v2101_v2, %v3363_v30 }
 0x5c9   : > { %v2127_v26 = vrot.slane %v2120_v3, %v3360_v23  ;;  %v2135_v27 = vrot.slane %v2568_v8, %v3360_v23  ;;  %v2143_v29 = vrot.slane %v2136_v19, %v3360_v23  ;;  %v2151_v31 = vrot.slane %v2569_v20, %v3360_v23  ;;  %v2572_v8 = vld [vmem:[%s3715_s6] ss:$0 sm:$0xff] }
 0x5ca   : > { %v2188_v4 = vcombine.low %v2092_v21, %v2099_v22  ;;  %v2570_v28 = vcombine.high %v2092_v21, %v2099_v22  ;;  %v2204_v33 = vcombine.low %v2108_v24, %v2115_v25  ;;  %v2571_v18 = vcombine.high %v2108_v24, %v2115_v25 }
 0x5cb   : > { %v2153_v32 = vcombine.high %v2127_v26, %v2135_v27  ;;  %v2169_v34 = vcombine.high %v2143_v29, %v2151_v31  ;;  %v2152_v35 = vcombine.low %v2127_v26, %v2135_v27  ;;  %v2168_v36 = vcombine.low %v2143_v29, %v2151_v31 }
 0x5cc   : > { %v2195_v38 = vrot.slane %v2188_v4, %v3360_v23  ;;  %v2203_v39 = vrot.slane %v2570_v28, %v3360_v23  ;;  %v2211_v40 = vrot.slane %v2204_v33, %v3360_v23  ;;  %v2219_v41 = vrot.slane %v2571_v18, %v3360_v23 }
 0x5cd   : > { %v2167_v42 = vrot.slane %v2153_v32, %v3363_v30  ;;  %v2183_v43 = vrot.slane %v2169_v34, %v3363_v30  ;;  %v2160_v44 = vrot.slane %v2152_v35, %v3363_v30  ;;  %v2176_v45 = vrot.slane %v2168_v36, %v3363_v30 }
 0x5ce   : > { %v2221_v46 = vcombine.high %v2195_v38, %v2203_v39  ;;  %v2237_v47 = vcombine.high %v2211_v40, %v2219_v41  ;;  %v2220_v48 = vcombine.low %v2195_v38, %v2203_v39  ;;  %v2236_v49 = vcombine.low %v2211_v40, %v2219_v41 }
 0x5cf   : > { %v2186_v58 = vcombine.low %v2167_v42, %v2183_v43  ;;  %v2185_v60 = vcombine.high %v2160_v44, %v2176_v45  ;;  %v2187_v51 = vcombine.high %v2167_v42, %v2183_v43  ;;  %v2184_v7 = vcombine.low %v2160_v44, %v2176_v45 }
 0x5d0   : > { %v2235_v23 = vrot.slane %v2221_v46, %v3363_v30  ;;  %v2251_v1 = vrot.slane %v2237_v47, %v3363_v30  ;;  %v2228_v52 = vrot.slane %v2220_v48, %v3363_v30  ;;  %v2244_v56 = vrot.slane %v2236_v49, %v3363_v30 }
 0x5d2   : > { %v2254_v54 = vcombine.low %v2235_v23, %v2251_v1  ;;  %v2253_v14 = vcombine.high %v2228_v52, %v2244_v56  ;;  %v2255_v55 = vcombine.high %v2235_v23, %v2251_v1  ;;  %v2252_v61 = vcombine.low %v2228_v52, %v2244_v56 }
 0x5d4   : > { %v2798_v62 = vpack.i.bf16 %v2254_v54, %v2186_v58  ;;  %v2793_v0 = vpack.i.bf16 %v2253_v14, %v2185_v60  ;;  %v2803_v6 = vpack.i.bf16 %v2255_v55, %v2187_v51 }
 0x5d6   : > { %2799 = vrot.lane.b32.xlu1 %v2798_v62, %s3054_s16  ;;  %2794 = vrot.lane.b32.xlu0 %v2793_v0, %s3056_s15  ;;  %s2974_s16 = sshll.u32 %s3059_s10, 4  ;;  %s2975_s16 = int_to_ptr.vmem [resolvable:$false] %s2974_s16 }
 0x5d7   : > { %p2977_p5 = scmp.lt.s32.totalorder %s3660_s30, %s2975_s16 }
 0x5da   : > { %2804 = vrot.lane.b32.xlu1 %v2803_v6, %s3055_s19  ;;  %s2976_s19 = scalar_lea.vmem %s2975_s16, 512 }
 0x5db   : > { %p2978_p9 = scmp.lt.s32.totalorder %s2976_s19, %s2970_s28 }
 0x5dd   : > { %p2979_p12 = por %p2978_p9, %p2977_p5 }
 0x5df   : > { %p2980_p2 = pnand %p2979_p12, %p2973_p3 }
 0x648   : > { %v2800_v57 = vpop.permute.xlu1 %2799  ;;  %v2795_v59 = vpop.permute.xlu0 %2794 }
 0x649   : > { %v2797_v9 = vunpack.i.h.bf16 %v2795_v59  ;;  %v2796_v10 = vunpack.i.l.bf16 %v2795_v59  ;;  %v2802_v30 = vunpack.i.h.bf16 %v2800_v57  ;;  %v2801_v11 = vunpack.i.l.bf16 %v2800_v57 }
 0x64b   : > { %v2280_v13 = vsel %vm1526_vm1, %v2184_v7, %v2796_v10  ;;  %v2281_v50 = vsel %vm1526_vm1, %v2252_v61, %v2797_v9 }
 0x64c   : > { %v2805_v15 = vpop.permute.xlu1 %2804  ;;  %v2283_v17 = vsel %vm2282_vm3, %v2280_v13, %v2801_v11  ;;  %v2284_v5 = vsel %vm2282_vm3, %v2281_v50, %v2802_v30 }
 0x64d   : > { %v2807_v16 = vunpack.i.h.bf16 %v2805_v15  ;;  %v2806_v63 = vunpack.i.l.bf16 %v2805_v15 }
 0x64f   : > { %v2286_v12 = vsel %vm2285_vm4, %v2283_v17, %v2806_v63  ;;  %v2287_v2 = vsel %vm2285_vm4, %v2284_v5, %v2807_v16 }
 0x650   : > { %v2288_v3 = vpack.c.bf16 %v2287_v2, %v2286_v12 }
 0x652   : > { %2707 = vmatmul.mubr.bf16.vlgmr.msra.gmra.mrb[12].mxu0 %v2288_v3 }
 0x725   : > { %v2394_v19 = vpop.f32.mrb[12].mxu0 }
 0x726   : > { %v2395_v20 = vadd.f32 %v2572_v8, %v2394_v19  ;;  %v2708_v21 = vpop.f32.mrb[13].mxu0 }
 0x727   : > { %v2397_v22 = vpop.f32.mrb[14].mxu0 }
 0x728   : > { %2401 = vst [vmem:[%s325_s22] sm:$0xff] %v2395_v20  ;;  %v2398_v24 = vadd.f32 %v2572_v8, %v2397_v22  ;;  %v2709_v25 = vpop.f32.mrb[15].mxu0 }
 0x72a   : > { %2402 = vst [vmem:[%s325_s22 + $0x8] sm:$0xff] %v2398_v24 }
 0x72b   : > { %2983 = shalt.err (!%p2980_p2)
}
 0x72c   : > { %s2984_s15 = scalar_lea.hbm %s3665_s29, 256  ;;  %s2988_s22 = scalar_lea.hbm %s3716_s7, 512 }
 0x72d   : > { %p2985_p13 = scmp.ne.s32.totalorder %s3665_s29, %s2984_s15  ;;  %p2989_p4 = scmp.lt.u32.totalorder %s3665_s29, %s3716_s7 }
 0x72e   : > { %p2990_p7 = scmp.lt.u32.totalorder %s2988_s22, %s2984_s15  ;;  %p2992_p11 = scmp.lt.u32.totalorder %s2984_s15, %s3665_s29 }
 0x72f   : > { %p2986_p6 = pnand %p2985_p13, %p3730_p0 }
 0x730   : > { %p2991_p8 = por %p2990_p7, %p2989_p4 }
 0x731   : > { %p2987_p10 = pneg %p2986_p6 }
 0x732   : > { %p2993_p1 = por %p2992_p11, %p2991_p8 }
 0x734   : > { %p2994_p3 = pnand %p2993_p1, %p2987_p10 }
 0x736   : > { %2997 = shalt.err (!%p2994_p3)
}
 0x737   : > { %s3060_s23 = smov 128   ;;  %s3061_s28 = smov 8  }
 0x738   : > { %2720 = dma.vmem_to_hbm [thread:$0]  (%p3730_p0), %s3660_s30, 256, %s3665_s29, %s2404_s21, %s3060_s23, %s3060_s23, %s3061_s28  }
 0x739 PF: > { %s2432_s10 = sand.u32 1, %s3028_s24   ;;  %p3731_p5 = scmp.ne.s32.totalorder %s3721_s8, 0 }
 0x73a   : > { %p3732_p9 = scmp.ge.s32.totalorder %s3040_s27, 2  ;;  %s2433_s16 = scalar_lea.sflag [#allocation4], %s2432_s10 }
 0x73c   : > { %p2734_p12 = pnand %p3732_p9, %p3731_p5 }
 0x73e   : > { %3023 = dma.done.wait (!%p2734_p12), %s2433_s16, 256  }
 0x73f   : > { %3025 = vsyncadd (!%p2734_p12), %s2433_s16, 4294967040  ;;  %p21_p2 = scmp.ge.s32.totalorder %s3212_s13, 4   ;;  %s3733_s24 = smov %s3032_s25 }
 0x740   : > { %s3734_s25 = smov %s3036_s26  ;;  %s3735_s26 = smov %s3221_s17 }
 0x741   : > { %s3736_s27 = smov %s3212_s13  ;;  %23 = sbr.rel (!%p21_p2) target bundleno = 6 (0x6), region = 101 }
 0x748   :  { %2438 = vsyncpa [#allocation3], 1 }
 0x749   :  { %2440 = vsyncpa [#allocation3 + $0x1], 1 }
 0x74a   :  { %2441 = vsyncpa [#allocation6], 1 }
 0x74b   :  { %2442 = vsyncpa [#allocation4], 1 }
 0x74c   :  { %2444 = vsyncpa [#allocation4 + $0x1], 1 }

</bundles_post_ra>
